<compile_context>
chip_gen: v7x
topology: tpu7x:2x2x1
jax: 0.10.0
libtpu: 0.0.40
codegen_flags: <defaults>
</compile_context>

<pallas_src>
import functools

import numpy as np
import jax
import jax.numpy as jnp
from jax import lax
from jax.experimental import pallas as pl
from jax.experimental.pallas import tpu as pltpu


def _round_up(x, m):
    return ((x + m - 1) // m) * m


def _vmem_capacity_bytes(default=64 << 20):
    """Physical VMEM per TensorCore (128 MiB v5e/v6e, 64 MiB v7x); conservative fallback."""
    try:
        info = pltpu.get_tpu_info()
        return int(getattr(info, "vmem_capacity_bytes", default))
    except Exception:
        return default


def _lss_vmem_params():
    phys = _vmem_capacity_bytes()
    limit = int(min(phys * 3 // 4, 100 << 20))    # ~96 MiB on v5e/v6e, ~48 MiB on v7x
    budget = int(min(phys * 2 // 5, 64 << 20))    # ~51 MiB on v5e/v6e, ~25 MiB on v7x
    return budget, limit


# ----------------------------------------------------------------------------
# Pallas kernels
# ----------------------------------------------------------------------------
def _gemm_bias_act_kernel(x_ref, w_ref, b_ref, o_ref, *, relu):
    # x: (tile_p, K) bf16   w: (K, Cout) bf16   b: (1, Cout) f32   o: (tile_p, Cout)
    y = jnp.dot(x_ref[...], w_ref[...], preferred_element_type=jnp.float32)
    y = y + b_ref[...]
    if relu:
        y = jnp.maximum(y, 0.0)
    o_ref[...] = y.astype(o_ref.dtype)


def gemm_bias_act(x, w, b, *, relu=True, out_dtype=jnp.bfloat16, tile_p=1024):
    """y = act((x @ w) + b), row-tiled.  BN scale is pre-folded into `w` by the caller."""
    P, K = x.shape
    Cout = w.shape[1]
    Kp = max(16, _round_up(K, 16))               # bf16 sublane packing
    if Kp != K:
        x = jnp.pad(x, ((0, 0), (0, Kp - K)))
        w = jnp.pad(w, ((0, Kp - K), (0, 0)))
    tile_p = min(tile_p, _round_up(P, 8))
    Pp = _round_up(P, tile_p)
    if Pp != P:
        x = jnp.pad(x, ((0, Pp - P), (0, 0)))

    itm_in = np.dtype(x.dtype).itemsize
    itm_out = np.dtype(out_dtype).itemsize
    cost = pl.CostEstimate(
        flops=2 * Pp * Kp * Cout,
        transcendentals=0,
        bytes_accessed=(Pp * Kp + Kp * Cout) * itm_in + Pp * Cout * itm_out,
    )
    out = pl.pallas_call(
        functools.partial(_gemm_bias_act_kernel, relu=relu),
        out_shape=jax.ShapeDtypeStruct((Pp, Cout), out_dtype),
        grid=(Pp // tile_p,),
        in_specs=[
            pl.BlockSpec((tile_p, Kp), lambda i: (i, 0)),
            pl.BlockSpec((Kp, Cout), lambda i: (0, 0)),
            pl.BlockSpec((1, Cout), lambda i: (0, 0)),
        ],
        out_specs=pl.BlockSpec((tile_p, Cout), lambda i: (i, 0)),
        compiler_params=pltpu.CompilerParams(
            dimension_semantics=("parallel",),
            vmem_limit_bytes=32 * 1024 * 1024,    # the GEMM tiles need <8 MiB
        ),
        cost_estimate=cost,
    )(x, w, b.reshape(1, Cout).astype(jnp.float32))
    return out[:P] if Pp != P else out


def _lss_kernel(d_ref, x_ref, wd_ref, wx_ref, b_ref, o_ref, *, D, Dp, C):
    # d: (1, T, Kd) bf16   x: (1, T, Cx) bf16   wd: (Kd, Dp+C)   wx: (Cx, Dp+C)   b: (1, Dp+C) f32
    # o: (1, D, T, C) bf16 -- a block of the FINAL (BN, D, fH*fW, C) layout, so no HBM transpose
    # is needed after the kernel.  Columns D..Dp of the logits carry bias -1e30 -> exp()==0, so
    # the softmax is unaffected and the feature slice below starts on a lane (128) boundary.
    y = jnp.dot(d_ref[0], wd_ref[...], preferred_element_type=jnp.float32)
    y = y + jnp.dot(x_ref[0], wx_ref[...], preferred_element_type=jnp.float32)
    y = y + b_ref[...]
    logits = y[:, :Dp]                       # depth logits     (T, Dp)
    feat = y[:, Dp:Dp + C]                   # image features   (T, C), lane-aligned slice
    m = jnp.max(logits, axis=1, keepdims=True)
    e = jnp.exp(logits - m)
    inv = pl.reciprocal(jnp.sum(e, axis=1, keepdims=True), approx=True)   # EUP slot
    prob = e * inv                           # softmax over depth bins (f32)
    # depth (x) feature outer product, written depth-major to match the final layout.
    # f32 multiply, bf16 only at the store (per review).  Static per-bin slices/stores are the
    # proven-lowering path; see the module-level TODO for the large-D production variant.
    for dd in range(D):
        o_ref[0, dd, :, :] = (prob[:, dd:dd + 1] * feat).astype(o_ref.dtype)


def _pick_tile_hw(HW, BN, D, C, Kd, Cx, Dp, vmem_budget, out_itemsize):
    # Per-pixel VMEM: double-buffered out block + double-buffered bf16 input blocks + f32 y/prob.
    per_px = (2 * D * C * out_itemsize
              + 2 * 2 * (Kd + Cx) * 2
              + (Dp + C) * 4 + Dp * 4)
    cap = max(8, vmem_budget // max(per_px, 1))
    cap = max(8, min(2048, (cap // 8) * 8))
    hw8 = _round_up(HW, 8)
    t_max = min(hw8, cap)
    # prefer tiles that divide HW exactly (no padded pixels -> no post-kernel slice pass)
    divisors = [c for c in range(t_max, 7, -8) if HW % c == 0]
    if not divisors:
        return t_max
    # keep >= 4 grid tiles so v7x's two TensorCores both get work (megacore sharding)
    for c in divisors:
        if BN * (HW // c) >= 4:
            return c
    return divisors[0]


def lss_depth_feat(d, x, w_d, w_x, b, *, D, Dp, C, out_dtype=jnp.bfloat16):
    """Fused depthnet(1x1) + softmax over D + depth⊗feature, emitted directly in the
    final (BN, D, HW, C) layout (bf16 store, f32 accumulate/softmax inside)."""
    BN, HW, Kd = d.shape
    Cx = x.shape[2]
    vmem_budget, vmem_limit = _lss_vmem_params()
    out_it = np.dtype(out_dtype).itemsize
    tile_hw = _pick_tile_hw(HW, BN, D, C, Kd, Cx, Dp, vmem_budget, out_it)
    HWp = _round_up(HW, tile_hw)
    if HWp != HW:
        d = jnp.pad(d, ((0, 0), (0, HWp - HW), (0, 0)))
        x = jnp.pad(x, ((0, 0), (0, HWp - HW), (0, 0)))

    itm_in = np.dtype(d.dtype).itemsize
    cost = pl.CostEstimate(
        flops=2 * BN * HWp * (Kd + Cx) * (Dp + C) + 2 * BN * HWp * D * C,
        transcendentals=BN * HWp * Dp,
        bytes_accessed=BN * HWp * ((Kd + Cx) * itm_in + D * C * out_it),
    )
    out = pl.pallas_call(
        functools.partial(_lss_kernel, D=D, Dp=Dp, C=C),
        out_shape=jax.ShapeDtypeStruct((BN, D, HWp, C), out_dtype),
        grid=(BN, HWp // tile_hw),
        in_specs=[
            pl.BlockSpec((1, tile_hw, Kd), lambda bn, t: (bn, t, 0)),
            pl.BlockSpec((1, tile_hw, Cx), lambda bn, t: (bn, t, 0)),
            pl.BlockSpec((Kd, Dp + C), lambda bn, t: (0, 0)),
            pl.BlockSpec((Cx, Dp + C), lambda bn, t: (0, 0)),
            pl.BlockSpec((1, Dp + C), lambda bn, t: (0, 0)),
        ],
        out_specs=pl.BlockSpec((1, D, tile_hw, C), lambda bn, t: (bn, 0, t, 0)),
        compiler_params=pltpu.CompilerParams(
            dimension_semantics=("parallel", "parallel"),
            vmem_limit_bytes=vmem_limit,
        ),
        cost_estimate=cost,
    )(d, x, w_d, w_x, b.reshape(1, Dp + C).astype(jnp.float32))
    return out[:, :, :HW, :] if HWp != HW else out


# ----------------------------------------------------------------------------
# Plain-JAX glue: im2col, BN folding, layout plumbing
# ----------------------------------------------------------------------------
def im2col_nhwc(x, k, stride, pad):
    B, H, W, Cin = x.shape
    xp = jnp.pad(x, ((0, 0), (pad, pad), (pad, pad), (0, 0)))
    Ho = (H + 2 * pad - k) // stride + 1
    Wo = (W + 2 * pad - k) // stride + 1
    cols = []
    for kh in range(k):
        for kw in range(k):
            cols.append(xp[:, kh:kh + stride * Ho:stride,
                           kw:kw + stride * Wo:stride, :])
    patches = jnp.stack(cols, axis=3)                 # (B, Ho, Wo, k*k, Cin)
    return patches.reshape(B * Ho * Wo, k * k * Cin), Ho, Wo


def conv_bn_relu_gemm(x_nhwc, w_pt, b_conv, gamma, beta, mean, var, *, k, stride,
                      pad, eps=1e-5, cout_pad_to=None, compute_dtype=jnp.bfloat16,
                      tile_p=1024):
    """PyTorch Conv2d (OIHW weights) + eval-mode BN + ReLU via im2col + Pallas GEMM.
    The BN scale is folded into the weight matrix; optionally zero-pads Cout so stores
    are lane-dense."""
    patches, Ho, Wo = im2col_nhwc(x_nhwc, k, stride, pad)
    Cout = w_pt.shape[0]
    s = gamma / jnp.sqrt(var + eps)
    bias = (b_conv - mean) * s + beta
    w_mat = jnp.transpose(w_pt, (2, 3, 1, 0)).reshape(-1, Cout) * s[None, :]
    if cout_pad_to is not None and cout_pad_to > Cout:
        w_mat = jnp.pad(w_mat, ((0, 0), (0, cout_pad_to - Cout)))
        bias = jnp.pad(bias, (0, cout_pad_to - Cout))
        Cout = cout_pad_to
    y = gemm_bias_act(patches.astype(compute_dtype), w_mat.astype(compute_dtype),
                      bias, relu=True, out_dtype=compute_dtype, tile_p=tile_p)
    return y.reshape(x_nhwc.shape[0], Ho, Wo, Cout)


def view_transform_get_cam_feats(feats, depth, params, *, D, C,
                                 compute_dtype=jnp.bfloat16,
                                 out_dtype=jnp.bfloat16):
    """feats: (B, N, Cin, fH, fW), depth: (B, N, 1, H, W)  (PyTorch NCHW layouts)."""
    B, N, Cin, fH, fW = feats.shape
    BN = B * N
    H, W = depth.shape[3], depth.shape[4]
    p = params
    cd = compute_dtype

    # ---------------- dtransform ----------------
    d_img = jnp.transpose(depth.reshape(BN, 1, H, W), (0, 2, 3, 1))      # (BN, H, W, 1)

    # conv1: 1x1, 1->8 (+BN+ReLU).  K=1 is pure MXU waste -> folded per-channel scale/bias,
    # fused XLA elementwise instead of a separate Pallas GEMM launch.
    s1 = p["g1"] / jnp.sqrt(p["v1"] + 1e-5)
    a1 = p["w1"].reshape(-1) * s1
    b1 = (p["b1"] - p["m1"]) * s1 + p["be1"]
    d1 = jax.nn.relu(d_img * a1 + b1).astype(cd)                          # (BN, H, W, 8)

    # conv2: 5x5 / stride 4 (+BN+ReLU)
    d2 = conv_bn_relu_gemm(d1, p["w2"], p["b2"], p["g2"], p["be2"], p["m2"], p["v2"],
                           k=5, stride=4, pad=2, compute_dtype=cd)
    # conv3: 5x5 / stride 2 (+BN+ReLU), Cout padded 64->128 (lane-dense stores); the zero
    # channels are consumed by zero rows of w_d below, so nothing is sliced.
    d3 = conv_bn_relu_gemm(d2, p["w3"], p["b3"], p["g3"], p["be3"], p["m3"], p["v3"],
                           k=5, stride=2, pad=2, cout_pad_to=128, compute_dtype=cd)
    assert d3.shape[1] == fH and d3.shape[2] == fW, (d3.shape, fH, fW)
    d3 = d3.reshape(BN, fH * fW, 128)

    # image features -> pixel-major, channels-last
    x = jnp.transpose(feats.reshape(BN, Cin, fH, fW), (0, 2, 3, 1))
    x = x.reshape(BN, fH * fW, Cin).astype(cd)

    # depthnet 1x1 weights, split so torch.cat([d, x], dim=1) never materializes.
    # The depth-logit columns are padded to a 128 multiple (bias -1e30 -> exp()==0) so the
    # feature slice inside the kernel is lane-aligned.
    Dp = _round_up(D, 128)
    w_dn = p["w_dn"].reshape(D + C, 64 + Cin).T                           # (64+Cin, D+C)
    w_full = jnp.concatenate(
        [jnp.pad(w_dn[:, :D], ((0, 0), (0, Dp - D))), w_dn[:, D:]], axis=1)   # (64+Cin, Dp+C)
    b_full = jnp.concatenate(
        [p["b_dn"][:D], jnp.full((Dp - D,), -1e30, jnp.float32), p["b_dn"][D:]])
    w_d = jnp.pad(w_full[:64], ((0, 128 - 64), (0, 0))).astype(cd)        # rows acting on d3
    w_x = w_full[64:].astype(cd)                                          # rows acting on x

    Cxp = _round_up(Cin, 8)
    if Cxp != Cin:
        x = jnp.pad(x, ((0, 0), (0, 0), (0, Cxp - Cin)))
        w_x = jnp.pad(w_x, ((0, Cxp - Cin), (0, 0)))

    out = lss_depth_feat(d3, x, w_d, w_x, b_full, D=D, Dp=Dp, C=C,
                         out_dtype=out_dtype)                             # (BN, D, HW, C)
    # pure reshape (row-major compatible) -- no transpose / extra HBM pass
    return out.reshape(B, N, D, fH, fW, C)


# ----------------------------------------------------------------------------
# Deterministic parameter init (shapes from DepthLSSTransform.__init__)
# ----------------------------------------------------------------------------
def init_params(key, Cin, D, C):
    keys = iter(jax.random.split(key, 32))

    def conv_w(shape):
        fan_in = shape[1] * shape[2] * shape[3]
        return jax.random.normal(next(keys), shape, jnp.float32) / jnp.sqrt(fan_in)

    def bn(c):
        g = 1.0 + 0.1 * jax.random.normal(next(keys), (c,), jnp.float32)
        be = 0.05 * jax.random.normal(next(keys), (c,), jnp.float32)
        m = 0.05 * jax.random.normal(next(keys), (c,), jnp.float32)
        v = 0.5 + 0.5 * jnp.abs(jax.random.normal(next(keys), (c,), jnp.float32))
        return g, be, m, v

    p = {}
    p["w1"] = conv_w((8, 1, 1, 1))
    p["b1"] = 0.01 * jax.random.normal(next(keys), (8,), jnp.float32)
    p["g1"], p["be1"], p["m1"], p["v1"] = bn(8)

    p["w2"] = conv_w((32, 8, 5, 5))
    p["b2"] = 0.01 * jax.random.normal(next(keys), (32,), jnp.float32)
    p["g2"], p["be2"], p["m2"], p["v2"] = bn(32)

    p["w3"] = conv_w((64, 32, 5, 5))
    p["b3"] = 0.01 * jax.random.normal(next(keys), (64,), jnp.float32)
    p["g3"], p["be3"], p["m3"], p["v3"] = bn(64)

    p["w_dn"] = conv_w((D + C, 64 + Cin, 1, 1))
    p["b_dn"] = 0.01 * jax.random.normal(next(keys), (D + C,), jnp.float32)
    return p


# ----------------------------------------------------------------------------
# Pure-JAX reference (mirrors the PyTorch NCHW math) for the correctness check
# ----------------------------------------------------------------------------
def _conv2d_nchw(x, w, b, stride, pad):
    y = lax.conv_general_dilated(
        x, w, window_strides=(stride, stride),
        padding=((pad, pad), (pad, pad)),
        dimension_numbers=("NCHW", "OIHW", "NCHW"),
        precision=lax.Precision.HIGHEST)
    return y + b[None, :, None, None]


def _bn_eval(x, g, be, m, v, eps=1e-5):
    return (x - m[None, :, None, None]) / jnp.sqrt(v[None, :, None, None] + eps) \
        * g[None, :, None, None] + be[None, :, None, None]


def reference_get_cam_feats(feats, depth, p, D, C):
    B, N, Cin, fH, fW = feats.shape
    d = depth.reshape(B * N, 1, depth.shape[3], depth.shape[4])
    x = feats.reshape(B * N, Cin, fH, fW)
    d = jax.nn.relu(_bn_eval(_conv2d_nchw(d, p["w1"], p["b1"], 1, 0),
                             p["g1"], p["be1"], p["m1"], p["v1"]))
    d = jax.nn.relu(_bn_eval(_conv2d_nchw(d, p["w2"], p["b2"], 4, 2),
                             p["g2"], p["be2"], p["m2"], p["v2"]))
    d = jax.nn.relu(_bn_eval(_conv2d_nchw(d, p["w3"], p["b3"], 2, 2),
                             p["g3"], p["be3"], p["m3"], p["v3"]))
    xx = jnp.concatenate([d, x], axis=1)
    y = _conv2d_nchw(xx, p["w_dn"], p["b_dn"], 1, 0)            # (BN, D+C, fH, fW)
    dep = jax.nn.softmax(y[:, :D], axis=1)
    out = dep[:, None] * y[:, D:D + C][:, :, None]              # (BN, C, D, fH, fW)
    out = out.reshape(B, N, C, D, fH, fW)
    return jnp.transpose(out, (0, 1, 3, 4, 5, 2))               # (B, N, D, fH, fW, C)


# ----------------------------------------------------------------------------
if __name__ == "__main__":
    B, N, Cin, fH, fW = 1, 2, 16, 8, 8       # feats channels / feature map size
    D, C = 8, 16                             # depth bins / output channels
    H, W = 8 * fH, 8 * fW                    # depth image is 8x the feature size

    key = jax.random.PRNGKey(0)
    k_feat, k_depth, k_par = jax.random.split(key, 3)
    feats = jax.random.normal(k_feat, (B, N, Cin, fH, fW), jnp.float32)
    depth = jax.random.normal(k_depth, (B, N, 1, H, W), jnp.float32)
    params = init_params(k_par, Cin, D, C)

    fwd = jax.jit(functools.partial(view_transform_get_cam_feats, D=D, C=C))
    out = jax.block_until_ready(fwd(feats, depth, params))
    assert out.shape == (B, N, D, fH, fW, C), out.shape

    ref = reference_get_cam_feats(feats, depth, params, D, C)
    scale = 1.0 + float(jnp.max(jnp.abs(ref)))
    max_err = float(jnp.max(jnp.abs(out.astype(jnp.float32) - ref)))
    # Tolerance sized for bf16 MXU operands / bf16-stored activations through the 3 stacked
    # GEMMs, the approx-reciprocal softmax and the bf16 output store, vs an f32 HIGHEST ref.
    assert max_err < 6e-2 * scale, f"max abs error {max_err} (ref scale {scale})"

    print("KERNEL_OK")
</pallas_src>

<mosaic_0001>
module attributes {stable_mosaic.version = 11 : i64} {
  func.func @_gemm_bias_act_kernel(%arg0: i32, %arg1: memref<512x208xbf16, #tpu.memory_space<vmem>>, %arg2: memref<208x32xbf16, #tpu.memory_space<vmem>>, %arg3: memref<1x32xf32, #tpu.memory_space<vmem>>, %arg4: memref<512x32xbf16, #tpu.memory_space<vmem>>) attributes {dimension_semantics = [#tpu.dimension_semantics<parallel>], iteration_bounds = array<i64: 1>, scalar_prefetch = 0 : i64, scratch_operands = 0 : i64, tpu.core_type = #tpu.core_type<tc>, window_params = [{transform_indices = @transform_0, window_bounds = array<i64: 512, 208>}, {pipeline_mode = #tpu.pipeline_mode<synchronous>, transform_indices = @transform_1, window_bounds = array<i64: 208, 32>}, {pipeline_mode = #tpu.pipeline_mode<synchronous>, transform_indices = @transform_2, window_bounds = array<i64: 1, 32>}, {transform_indices = @transform_3, window_bounds = array<i64: 512, 32>}]} {
    %c0 = arith.constant 0 : index
    %c0_0 = arith.constant 0 : index
    %0 = vector.load %arg1[%c0, %c0_0] : memref<512x208xbf16, #tpu.memory_space<vmem>>, vector<512x208xbf16>
    %c0_1 = arith.constant 0 : index
    %c0_2 = arith.constant 0 : index
    %1 = vector.load %arg2[%c0_1, %c0_2] : memref<208x32xbf16, #tpu.memory_space<vmem>>, vector<208x32xbf16>
    %cst = arith.constant dense<0.000000e+00> : vector<512x32xf32>
    %2 = tpu.matmul %0, %1, %cst {dimension_numbers = #tpu.dot_dimension_numbers<[1], [0], [0], [1], [0, 0, 1, 1], [], []>} : vector<512x208xbf16>, vector<208x32xbf16>, vector<512x32xf32> -> vector<512x32xf32>
    %c0_3 = arith.constant 0 : index
    %c0_4 = arith.constant 0 : index
    %3 = vector.load %arg3[%c0_3, %c0_4] : memref<1x32xf32, #tpu.memory_space<vmem>>, vector<1x32xf32>
    %4 = vector.broadcast %3 : vector<1x32xf32> to vector<512x32xf32>
    %5 = arith.addf %2, %4 : vector<512x32xf32>
    %cst_5 = arith.constant 0.000000e+00 : f32
    %6 = vector.broadcast %cst_5 : f32 to vector<512x32xf32>
    %7 = arith.maximumf %5, %6 : vector<512x32xf32>
    %8 = arith.truncf %7 : vector<512x32xf32> to vector<512x32xbf16>
    %c0_6 = arith.constant 0 : index
    %c0_7 = arith.constant 0 : index
    %9 = vector.load %arg4[%c0_6, %c0_7] : memref<512x32xbf16, #tpu.memory_space<vmem>>, vector<512x32xbf16>
    tpu.vector_store %arg4[%c0_6, %c0_7], %8 {strides = array<i32>} : memref<512x32xbf16, #tpu.memory_space<vmem>>, vector<512x32xbf16>,
    return
  }
  func.func @transform_0(%arg0: i32) -> (i32, i32) {
    %c0_i32 = arith.constant 0 : i32
    %c0_i32_0 = arith.constant 0 : i32
    return %arg0, %c0_i32 : i32, i32
  }
  func.func @transform_1(%arg0: i32) -> (i32, i32) {
    %c0_i32 = arith.constant 0 : i32
    %c0_i32_0 = arith.constant 0 : i32
    %c0_i32_1 = arith.constant 0 : i32
    return %c0_i32, %c0_i32_0 : i32, i32
  }
  func.func @transform_2(%arg0: i32) -> (i32, i32) {
    %c0_i32 = arith.constant 0 : i32
    %c0_i32_0 = arith.constant 0 : i32
    %c0_i32_1 = arith.constant 0 : i32
    return %c0_i32, %c0_i32_0 : i32, i32
  }
  func.func @transform_3(%arg0: i32) -> (i32, i32) {
    %c0_i32 = arith.constant 0 : i32
    %c0_i32_0 = arith.constant 0 : i32
    return %arg0, %c0_i32 : i32, i32
  }
}

module attributes {stable_mosaic.version = 11 : i64} {
  func.func @_gemm_bias_act_kernel(%arg0: i32, %arg1: memref<128x800xbf16, #tpu.memory_space<vmem>>, %arg2: memref<800x128xbf16, #tpu.memory_space<vmem>>, %arg3: memref<1x128xf32, #tpu.memory_space<vmem>>, %arg4: memref<128x128xbf16, #tpu.memory_space<vmem>>) attributes {dimension_semantics = [#tpu.dimension_semantics<parallel>], iteration_bounds = array<i64: 1>, scalar_prefetch = 0 : i64, scratch_operands = 0 : i64, tpu.core_type = #tpu.core_type<tc>, window_params = [{transform_indices = @transform_0, window_bounds = array<i64: 128, 800>}, {pipeline_mode = #tpu.pipeline_mode<synchronous>, transform_indices = @transform_1, window_bounds = array<i64: 800, 128>}, {pipeline_mode = #tpu.pipeline_mode<synchronous>, transform_indices = @transform_2, window_bounds = array<i64: 1, 128>}, {transform_indices = @transform_3, window_bounds = array<i64: 128, 128>}]} {
    %c0 = arith.constant 0 : index
    %c0_0 = arith.constant 0 : index
    %0 = vector.load %arg1[%c0, %c0_0] : memref<128x800xbf16, #tpu.memory_space<vmem>>, vector<128x800xbf16>
    %c0_1 = arith.constant 0 : index
    %c0_2 = arith.constant 0 : index
    %1 = vector.load %arg2[%c0_1, %c0_2] : memref<800x128xbf16, #tpu.memory_space<vmem>>, vector<800x128xbf16>
    %cst = arith.constant dense<0.000000e+00> : vector<128x128xf32>
    %2 = tpu.matmul %0, %1, %cst {dimension_numbers = #tpu.dot_dimension_numbers<[1], [0], [0], [1], [0, 0, 1, 1], [], []>} : vector<128x800xbf16>, vector<800x128xbf16>, vector<128x128xf32> -> vector<128x128xf32>
    %c0_3 = arith.constant 0 : index
    %c0_4 = arith.constant 0 : index
    %3 = vector.load %arg3[%c0_3, %c0_4] : memref<1x128xf32, #tpu.memory_space<vmem>>, vector<1x128xf32>
    %4 = vector.broadcast %3 : vector<1x128xf32> to vector<128x128xf32>
    %5 = arith.addf %2, %4 : vector<128x128xf32>
    %cst_5 = arith.constant 0.000000e+00 : f32
    %6 = vector.broadcast %cst_5 : f32 to vector<128x128xf32>
    %7 = arith.maximumf %5, %6 : vector<128x128xf32>
    %8 = arith.truncf %7 : vector<128x128xf32> to vector<128x128xbf16>
    %c0_6 = arith.constant 0 : index
    %c0_7 = arith.constant 0 : index
    %9 = vector.load %arg4[%c0_6, %c0_7] : memref<128x128xbf16, #tpu.memory_space<vmem>>, vector<128x128xbf16>
    tpu.vector_store %arg4[%c0_6, %c0_7], %8 {strides = array<i32>} : memref<128x128xbf16, #tpu.memory_space<vmem>>, vector<128x128xbf16>,
    return
  }
  func.func @transform_0(%arg0: i32) -> (i32, i32) {
    %c0_i32 = arith.constant 0 : i32
    %c0_i32_0 = arith.constant 0 : i32
    return %arg0, %c0_i32 : i32, i32
  }
  func.func @transform_1(%arg0: i32) -> (i32, i32) {
    %c0_i32 = arith.constant 0 : i32
    %c0_i32_0 = arith.constant 0 : i32
    %c0_i32_1 = arith.constant 0 : i32
    return %c0_i32, %c0_i32_0 : i32, i32
  }
  func.func @transform_2(%arg0: i32) -> (i32, i32) {
    %c0_i32 = arith.constant 0 : i32
    %c0_i32_0 = arith.constant 0 : i32
    %c0_i32_1 = arith.constant 0 : i32
    return %c0_i32, %c0_i32_0 : i32, i32
  }
  func.func @transform_3(%arg0: i32) -> (i32, i32) {
    %c0_i32 = arith.constant 0 : i32
    %c0_i32_0 = arith.constant 0 : i32
    return %arg0, %c0_i32 : i32, i32
  }
}

module attributes {stable_mosaic.version = 11 : i64} {
  func.func @_lss_kernel(%arg0: i32, %arg1: i32, %arg2: memref<1x32x128xbf16, #tpu.memory_space<vmem>>, %arg3: memref<1x32x16xbf16, #tpu.memory_space<vmem>>, %arg4: memref<128x144xbf16, #tpu.memory_space<vmem>>, %arg5: memref<16x144xbf16, #tpu.memory_space<vmem>>, %arg6: memref<1x144xf32, #tpu.memory_space<vmem>>, %arg7: memref<1x8x32x16xbf16, #tpu.memory_space<vmem>>) attributes {dimension_semantics = [#tpu.dimension_semantics<parallel>, #tpu.dimension_semantics<parallel>], iteration_bounds = array<i64: 2, 2>, scalar_prefetch = 0 : i64, scratch_operands = 0 : i64, tpu.core_type = #tpu.core_type<tc>, window_params = [{transform_indices = @transform_0, window_bounds = array<i64: 1, 32, 128>}, {transform_indices = @transform_1, window_bounds = array<i64: 1, 32, 16>}, {pipeline_mode = #tpu.pipeline_mode<synchronous>, transform_indices = @transform_2, window_bounds = array<i64: 128, 144>}, {pipeline_mode = #tpu.pipeline_mode<synchronous>, transform_indices = @transform_3, window_bounds = array<i64: 16, 144>}, {pipeline_mode = #tpu.pipeline_mode<synchronous>, transform_indices = @transform_4, window_bounds = array<i64: 1, 144>}, {transform_indices = @transform_5, window_bounds = array<i64: 1, 8, 32, 16>}]} {
    %c0 = arith.constant 0 : index
    %c0_0 = arith.constant 0 : index
    %c0_1 = arith.constant 0 : index
    %0 = vector.load %arg2[%c0, %c0_0, %c0_1] : memref<1x32x128xbf16, #tpu.memory_space<vmem>>, vector<1x32x128xbf16>
    %1 = vector.shape_cast %0 : vector<1x32x128xbf16> to vector<32x128xbf16>
    %c0_2 = arith.constant 0 : index
    %c0_3 = arith.constant 0 : index
    %2 = vector.load %arg4[%c0_2, %c0_3] : memref<128x144xbf16, #tpu.memory_space<vmem>>, vector<128x144xbf16>
    %cst = arith.constant dense<0.000000e+00> : vector<32x144xf32>
    %3 = tpu.matmul %1, %2, %cst {dimension_numbers = #tpu.dot_dimension_numbers<[1], [0], [0], [1], [0, 0, 1, 1], [], []>} : vector<32x128xbf16>, vector<128x144xbf16>, vector<32x144xf32> -> vector<32x144xf32>
    %c0_4 = arith.constant 0 : index
    %c0_5 = arith.constant 0 : index
    %c0_6 = arith.constant 0 : index
    %4 = vector.load %arg3[%c0_4, %c0_5, %c0_6] : memref<1x32x16xbf16, #tpu.memory_space<vmem>>, vector<1x32x16xbf16>
    %5 = vector.shape_cast %4 : vector<1x32x16xbf16> to vector<32x16xbf16>
    %c0_7 = arith.constant 0 : index
    %c0_8 = arith.constant 0 : index
    %6 = vector.load %arg5[%c0_7, %c0_8] : memref<16x144xbf16, #tpu.memory_space<vmem>>, vector<16x144xbf16>
    %cst_9 = arith.constant dense<0.000000e+00> : vector<32x144xf32>
    %7 = tpu.matmul %5, %6, %cst_9 {dimension_numbers = #tpu.dot_dimension_numbers<[1], [0], [0], [1], [0, 0, 1, 1], [], []>} : vector<32x16xbf16>, vector<16x144xbf16>, vector<32x144xf32> -> vector<32x144xf32>
    %8 = arith.addf %3, %7 : vector<32x144xf32>
    %c0_10 = arith.constant 0 : index
    %c0_11 = arith.constant 0 : index
    %9 = vector.load %arg6[%c0_10, %c0_11] : memref<1x144xf32, #tpu.memory_space<vmem>>, vector<1x144xf32>
    %10 = vector.broadcast %9 : vector<1x144xf32> to vector<32x144xf32>
    %11 = arith.addf %8, %10 : vector<32x144xf32>
    %12 = vector.extract_strided_slice %11 {offsets = [0, 0], sizes = [32, 128], strides = [1, 1]} : vector<32x144xf32> to vector<32x128xf32>
    %13 = vector.extract_strided_slice %11 {offsets = [0, 128], sizes = [32, 16], strides = [1, 1]} : vector<32x144xf32> to vector<32x16xf32>
    %cst_12 = arith.constant dense<0xFF800000> : vector<32xf32>
    %14 = vector.multi_reduction <maximumf>, %12, %cst_12 [1] : vector<32x128xf32> to vector<32xf32>
    %15 = vector.shape_cast %14 : vector<32xf32> to vector<32x1xf32>
    %16 = vector.broadcast %15 : vector<32x1xf32> to vector<32x128xf32>
    %17 = arith.subf %12, %16 : vector<32x128xf32>
    %18 = math.exp %17 : vector<32x128xf32>
    %cst_13 = arith.constant dense<0.000000e+00> : vector<32xf32>
    %19 = vector.multi_reduction <add>, %18, %cst_13 [1] : vector<32x128xf32> to vector<32xf32>
    %20 = vector.shape_cast %19 : vector<32xf32> to vector<32x1xf32>
    %21 = tpu.reciprocal %20 {approx = true} : vector<32x1xf32> -> vector<32x1xf32>
    %22 = vector.broadcast %21 : vector<32x1xf32> to vector<32x128xf32>
    %23 = arith.mulf %18, %22 : vector<32x128xf32>
    %24 = vector.extract_strided_slice %23 {offsets = [0, 0], sizes = [32, 1], strides = [1, 1]} : vector<32x128xf32> to vector<32x1xf32>
    %25 = vector.broadcast %24 : vector<32x1xf32> to vector<32x16xf32>
    %26 = arith.mulf %25, %13 : vector<32x16xf32>
    %27 = arith.truncf %26 : vector<32x16xf32> to vector<32x16xbf16>
    %c0_14 = arith.constant 0 : index
    %c0_15 = arith.constant 0 : index
    %c0_16 = arith.constant 0 : index
    %c0_17 = arith.constant 0 : index
    %28 = vector.load %arg7[%c0_14, %c0_15, %c0_16, %c0_17] : memref<1x8x32x16xbf16, #tpu.memory_space<vmem>>, vector<1x1x32x16xbf16>
    %29 = vector.shape_cast %28 : vector<1x1x32x16xbf16> to vector<32x16xbf16>
    %30 = vector.shape_cast %27 : vector<32x16xbf16> to vector<1x1x32x16xbf16>
    tpu.vector_store %arg7[%c0_14, %c0_15, %c0_16, %c0_17], %30 {strides = array<i32>} : memref<1x8x32x16xbf16, #tpu.memory_space<vmem>>, vector<1x1x32x16xbf16>,
    %31 = vector.extract_strided_slice %23 {offsets = [0, 1], sizes = [32, 1], strides = [1, 1]} : vector<32x128xf32> to vector<32x1xf32>
    %32 = vector.broadcast %31 : vector<32x1xf32> to vector<32x16xf32>
    %33 = arith.mulf %32, %13 : vector<32x16xf32>
    %34 = arith.truncf %33 : vector<32x16xf32> to vector<32x16xbf16>
    %c0_18 = arith.constant 0 : index
    %c1 = arith.constant 1 : index
    %c0_19 = arith.constant 0 : index
    %c0_20 = arith.constant 0 : index
    %35 = vector.load %arg7[%c0_18, %c1, %c0_19, %c0_20] : memref<1x8x32x16xbf16, #tpu.memory_space<vmem>>, vector<1x1x32x16xbf16>
    %36 = vector.shape_cast %35 : vector<1x1x32x16xbf16> to vector<32x16xbf16>
    %37 = vector.shape_cast %34 : vector<32x16xbf16> to vector<1x1x32x16xbf16>
    tpu.vector_store %arg7[%c0_18, %c1, %c0_19, %c0_20], %37 {strides = array<i32>} : memref<1x8x32x16xbf16, #tpu.memory_space<vmem>>, vector<1x1x32x16xbf16>,
    %38 = vector.extract_strided_slice %23 {offsets = [0, 2], sizes = [32, 1], strides = [1, 1]} : vector<32x128xf32> to vector<32x1xf32>
    %39 = vector.broadcast %38 : vector<32x1xf32> to vector<32x16xf32>
    %40 = arith.mulf %39, %13 : vector<32x16xf32>
    %41 = arith.truncf %40 : vector<32x16xf32> to vector<32x16xbf16>
    %c0_21 = arith.constant 0 : index
    %c2 = arith.constant 2 : index
    %c0_22 = arith.constant 0 : index
    %c0_23 = arith.constant 0 : index
    %42 = vector.load %arg7[%c0_21, %c2, %c0_22, %c0_23] : memref<1x8x32x16xbf16, #tpu.memory_space<vmem>>, vector<1x1x32x16xbf16>
    %43 = vector.shape_cast %42 : vector<1x1x32x16xbf16> to vector<32x16xbf16>
    %44 = vector.shape_cast %41 : vector<32x16xbf16> to vector<1x1x32x16xbf16>
    tpu.vector_store %arg7[%c0_21, %c2, %c0_22, %c0_23], %44 {strides = array<i32>} : memref<1x8x32x16xbf16, #tpu.memory_space<vmem>>, vector<1x1x32x16xbf16>,
    %45 = vector.extract_strided_slice %23 {offsets = [0, 3], sizes = [32, 1], strides = [1, 1]} : vector<32x128xf32> to vector<32x1xf32>
    %46 = vector.broadcast %45 : vector<32x1xf32> to vector<32x16xf32>
    %47 = arith.mulf %46, %13 : vector<32x16xf32>
    %48 = arith.truncf %47 : vector<32x16xf32> to vector<32x16xbf16>
    %c0_24 = arith.constant 0 : index
    %c3 = arith.constant 3 : index
    %c0_25 = arith.constant 0 : index
    %c0_26 = arith.constant 0 : index
    %49 = vector.load %arg7[%c0_24, %c3, %c0_25, %c0_26] : memref<1x8x32x16xbf16, #tpu.memory_space<vmem>>, vector<1x1x32x16xbf16>
    %50 = vector.shape_cast %49 : vector<1x1x32x16xbf16> to vector<32x16xbf16>
    %51 = vector.shape_cast %48 : vector<32x16xbf16> to vector<1x1x32x16xbf16>
    tpu.vector_store %arg7[%c0_24, %c3, %c0_25, %c0_26], %51 {strides = array<i32>} : memref<1x8x32x16xbf16, #tpu.memory_space<vmem>>, vector<1x1x32x16xbf16>,
    %52 = vector.extract_strided_slice %23 {offsets = [0, 4], sizes = [32, 1], strides = [1, 1]} : vector<32x128xf32> to vector<32x1xf32>
    %53 = vector.broadcast %52 : vector<32x1xf32> to vector<32x16xf32>
    %54 = arith.mulf %53, %13 : vector<32x16xf32>
    %55 = arith.truncf %54 : vector<32x16xf32> to vector<32x16xbf16>
    %c0_27 = arith.constant 0 : index
    %c4 = arith.constant 4 : index
    %c0_28 = arith.constant 0 : index
    %c0_29 = arith.constant 0 : index
    %56 = vector.load %arg7[%c0_27, %c4, %c0_28, %c0_29] : memref<1x8x32x16xbf16, #tpu.memory_space<vmem>>, vector<1x1x32x16xbf16>
    %57 = vector.shape_cast %56 : vector<1x1x32x16xbf16> to vector<32x16xbf16>
    %58 = vector.shape_cast %55 : vector<32x16xbf16> to vector<1x1x32x16xbf16>
    tpu.vector_store %arg7[%c0_27, %c4, %c0_28, %c0_29], %58 {strides = array<i32>} : memref<1x8x32x16xbf16, #tpu.memory_space<vmem>>, vector<1x1x32x16xbf16>,
    %59 = vector.extract_strided_slice %23 {offsets = [0, 5], sizes = [32, 1], strides = [1, 1]} : vector<32x128xf32> to vector<32x1xf32>
    %60 = vector.broadcast %59 : vector<32x1xf32> to vector<32x16xf32>
    %61 = arith.mulf %60, %13 : vector<32x16xf32>
    %62 = arith.truncf %61 : vector<32x16xf32> to vector<32x16xbf16>
    %c0_30 = arith.constant 0 : index
    %c5 = arith.constant 5 : index
    %c0_31 = arith.constant 0 : index
    %c0_32 = arith.constant 0 : index
    %63 = vector.load %arg7[%c0_30, %c5, %c0_31, %c0_32] : memref<1x8x32x16xbf16, #tpu.memory_space<vmem>>, vector<1x1x32x16xbf16>
    %64 = vector.shape_cast %63 : vector<1x1x32x16xbf16> to vector<32x16xbf16>
    %65 = vector.shape_cast %62 : vector<32x16xbf16> to vector<1x1x32x16xbf16>
    tpu.vector_store %arg7[%c0_30, %c5, %c0_31, %c0_32], %65 {strides = array<i32>} : memref<1x8x32x16xbf16, #tpu.memory_space<vmem>>, vector<1x1x32x16xbf16>,
    %66 = vector.extract_strided_slice %23 {offsets = [0, 6], sizes = [32, 1], strides = [1, 1]} : vector<32x128xf32> to vector<32x1xf32>
    %67 = vector.broadcast %66 : vector<32x1xf32> to vector<32x16xf32>
    %68 = arith.mulf %67, %13 : vector<32x16xf32>
    %69 = arith.truncf %68 : vector<32x16xf32> to vector<32x16xbf16>
    %c0_33 = arith.constant 0 : index
    %c6 = arith.constant 6 : index
    %c0_34 = arith.constant 0 : index
    %c0_35 = arith.constant 0 : index
    %70 = vector.load %arg7[%c0_33, %c6, %c0_34, %c0_35] : memref<1x8x32x16xbf16, #tpu.memory_space<vmem>>, vector<1x1x32x16xbf16>
    %71 = vector.shape_cast %70 : vector<1x1x32x16xbf16> to vector<32x16xbf16>
    %72 = vector.shape_cast %69 : vector<32x16xbf16> to vector<1x1x32x16xbf16>
    tpu.vector_store %arg7[%c0_33, %c6, %c0_34, %c0_35], %72 {strides = array<i32>} : memref<1x8x32x16xbf16, #tpu.memory_space<vmem>>, vector<1x1x32x16xbf16>,
    %73 = vector.extract_strided_slice %23 {offsets = [0, 7], sizes = [32, 1], strides = [1, 1]} : vector<32x128xf32> to vector<32x1xf32>
    %74 = vector.broadcast %73 : vector<32x1xf32> to vector<32x16xf32>
    %75 = arith.mulf %74, %13 : vector<32x16xf32>
    %76 = arith.truncf %75 : vector<32x16xf32> to vector<32x16xbf16>
    %c0_36 = arith.constant 0 : index
    %c7 = arith.constant 7 : index
    %c0_37 = arith.constant 0 : index
    %c0_38 = arith.constant 0 : index
    %77 = vector.load %arg7[%c0_36, %c7, %c0_37, %c0_38] : memref<1x8x32x16xbf16, #tpu.memory_space<vmem>>, vector<1x1x32x16xbf16>
    %78 = vector.shape_cast %77 : vector<1x1x32x16xbf16> to vector<32x16xbf16>
    %79 = vector.shape_cast %76 : vector<32x16xbf16> to vector<1x1x32x16xbf16>
    tpu.vector_store %arg7[%c0_36, %c7, %c0_37, %c0_38], %79 {strides = array<i32>} : memref<1x8x32x16xbf16, #tpu.memory_space<vmem>>, vector<1x1x32x16xbf16>,
    return
  }
  func.func @transform_0(%arg0: i32, %arg1: i32) -> (i32, i32, i32) {
    %c0_i32 = arith.constant 0 : i32
    %c0_i32_0 = arith.constant 0 : i32
    return %arg0, %arg1, %c0_i32 : i32, i32, i32
  }
  func.func @transform_1(%arg0: i32, %arg1: i32) -> (i32, i32, i32) {
    %c0_i32 = arith.constant 0 : i32
    %c0_i32_0 = arith.constant 0 : i32
    return %arg0, %arg1, %c0_i32 : i32, i32, i32
  }
  func.func @transform_2(%arg0: i32, %arg1: i32) -> (i32, i32) {
    %c0_i32 = arith.constant 0 : i32
    %c0_i32_0 = arith.constant 0 : i32
    %c0_i32_1 = arith.constant 0 : i32
    return %c0_i32, %c0_i32_0 : i32, i32
  }
  func.func @transform_3(%arg0: i32, %arg1: i32) -> (i32, i32) {
    %c0_i32 = arith.constant 0 : i32
    %c0_i32_0 = arith.constant 0 : i32
    %c0_i32_1 = arith.constant 0 : i32
    return %c0_i32, %c0_i32_0 : i32, i32
  }
  func.func @transform_4(%arg0: i32, %arg1: i32) -> (i32, i32) {
    %c0_i32 = arith.constant 0 : i32
    %c0_i32_0 = arith.constant 0 : i32
    %c0_i32_1 = arith.constant 0 : i32
    return %c0_i32, %c0_i32_0 : i32, i32
  }
  func.func @transform_5(%arg0: i32, %arg1: i32) -> (i32, i32, i32, i32) {
    %c0_i32 = arith.constant 0 : i32
    %c0_i32_0 = arith.constant 0 : i32
    %c0_i32_1 = arith.constant 0 : i32
    return %arg0, %c0_i32, %arg1, %c0_i32_0 : i32, i32, i32, i32
  }
}

</mosaic_0001>

<bundles_post_ra>
// kernel: view_transform_get_cam_feats.3
= control target key start
LH: loop header
LB: loop body
LE: loop exit
PB: predicated region body
PF: predicated region fallthrough
CT: control target
= control target key end

     0   :  { %v1627_v0 = vmov 0   ;;  %vm478_vm0 = vcmask 654336   ;;  %vm1184_vm1 = vcmask 257024   ;;  %s2262_s1 = inlined_call_operand.vmem [shape: bf16[208,32], index: 1, kind: input, shape index: {}]   ;;  %s2263_s0 = inlined_call_operand.vmem [shape: bf16[512,208], index: 0, kind: input, shape index: {}]   ;;  %s2264_s2 = inlined_call_operand.vmem [shape: f32[1,32], index: 2, kind: input, shape index: {}]   ;;  %s2265_s3 = inlined_call_operand.vmem [shape: bf16[512,32], index: 3, kind: output, shape index: {}]  }
   0x1   :  { %575 = vmatprep.subr.bf16.mxu0 %v1627_v0  ;;  %1491 = vmatprep.subr.bf16.mxu1 %v1627_v0  ;;  %v1518_v1 = vld [vmem:[%s2262_s1] sm:$0xff]   ;;  %v1519_v2 = vld [vmem:[%s2262_s1 + $0x8] sm:$0xff]   ;;  %v1520_v3 = vld [vmem:[%s2262_s1 + $0x10] sm:$0xff]  }
   0x2   :  { %576 = vmatpush1.bf16.msra.mxu0 %v1518_v1  ;;  %1504 = vmatpush1.bf16.msra.mxu1 %v1518_v1  ;;  %v1521_v4 = vld [vmem:[%s2262_s1 + $0x18] sm:$0xff]   ;;  %v1522_v5 = vld [vmem:[%s2262_s1 + $0x20] sm:$0xff]   ;;  %v1523_v8 = vld [vmem:[%s2262_s1 + $0x28] sm:$0xff]  }
   0x3   :  { %577 = vmatprep.subr.bf16.mxu0 %v1627_v0  ;;  %1492 = vmatprep.subr.bf16.mxu1 %v1627_v0  ;;  %v1533_v6 = vld [vmem:[%s2263_s0 + $0x4] ss:$8 sps:$4 sm:$0xff]   ;;  %v1524_v9 = vld [vmem:[%s2262_s1 + $0x30] sm:$0xff]   ;;  %v1525_v10 = vld [vmem:[%s2262_s1 + $0x38] sm:$0xff]  }
   0x4   :  { %v1536_v7 = vld [vmem:[%s2263_s0 + $0x104] ss:$8 sps:$4 sm:$0xff]   ;;  %1331 = vmatprep.mubr.msk.bf16.mxu0 %vm478_vm0, %v1533_v6  ;;  %v1528_v13 = vld [vmem:[%s2262_s1 + $0x50] sm:$0xff]   ;;  %v1529_v14 = vld [vmem:[%s2262_s1 + $0x58] sm:$0xff]  }
   0x5   :  { %1347 = vmatprep.mubr.msk.bf16.mxu1 %vm478_vm0, %v1536_v7  ;;  %v1526_v11 = vld [vmem:[%s2262_s1 + $0x40] sm:$0xff]   ;;  %v1527_v12 = vld [vmem:[%s2262_s1 + $0x48] sm:$0xff]   ;;  %v1537_v18 = vld [vmem:[%s2263_s0 + $0x14] ss:$8 sps:$4 sm:$0xff]  }
   0x6   :  { %578 = vmatpush1.bf16.msra.mxu0 %v1519_v2  ;;  %1505 = vmatpush1.bf16.msra.mxu1 %v1519_v2  ;;  %v1530_v15 = vld [vmem:[%s2262_s1 + $0x60] sm:$0xff]   ;;  %v1539_v19 = vld [vmem:[%s2263_s0 + $0x114] ss:$8 sps:$4 sm:$0xff]   ;;  %v1541_v20 = vld [vmem:[%s2263_s0 + $0x10] ss:$8 sps:$4 sm:$0xff]  }
   0x7   :  { %579 = vmatprep.subr.bf16.mxu0 %v1627_v0  ;;  %1493 = vmatprep.subr.bf16.mxu1 %v1627_v0  ;;  %v1531_v16 = vld [vmem:[%s2263_s0] ss:$8 sps:$4 sm:$0xff]   ;;  %v1542_v21 = vld [vmem:[%s2263_s0 + $0x110] ss:$8 sps:$4 sm:$0xff]   ;;  %v1543_v22 = vld [vmem:[%s2263_s0 + $0x24] ss:$8 sps:$4 sm:$0xff]  }
   0x8   :  { %v1534_v17 = vld [vmem:[%s2263_s0 + $0x100] ss:$8 sps:$4 sm:$0xff]   ;;  %v1545_v23 = vld [vmem:[%s2263_s0 + $0x124] ss:$8 sps:$4 sm:$0xff]   ;;  %v1549_v26 = vld [vmem:[%s2263_s0 + $0x34] ss:$8 sps:$4 sm:$0xff]  }
   0x9   :  { %v1547_v24 = vld [vmem:[%s2263_s0 + $0x20] ss:$8 sps:$4 sm:$0xff]   ;;  %v1551_v27 = vld [vmem:[%s2263_s0 + $0x134] ss:$8 sps:$4 sm:$0xff]   ;;  %v1553_v28 = vld [vmem:[%s2263_s0 + $0x30] ss:$8 sps:$4 sm:$0xff]  }
   0xa   :  { %580 = vmatpush1.bf16.msra.mxu0 %v1520_v3  ;;  %1506 = vmatpush1.bf16.msra.mxu1 %v1520_v3  ;;  %v1548_v25 = vld [vmem:[%s2263_s0 + $0x120] ss:$8 sps:$4 sm:$0xff]   ;;  %v1554_v29 = vld [vmem:[%s2263_s0 + $0x130] ss:$8 sps:$4 sm:$0xff]   ;;  %v1555_v30 = vld [vmem:[%s2263_s0 + $0x44] ss:$8 sps:$4 sm:$0xff]  }
   0xb   :  { %581 = vmatprep.subr.bf16.mxu0 %v1627_v0  ;;  %1494 = vmatprep.subr.bf16.mxu1 %v1627_v0  ;;  %v1557_v31 = vld [vmem:[%s2263_s0 + $0x144] ss:$8 sps:$4 sm:$0xff]   ;;  %v1559_v32 = vld [vmem:[%s2263_s0 + $0x40] ss:$8 sps:$4 sm:$0xff]   ;;  %v1561_v34 = vld [vmem:[%s2263_s0 + $0x54] ss:$8 sps:$4 sm:$0xff]  }
   0xc   :  { %v1560_v33 = vld [vmem:[%s2263_s0 + $0x140] ss:$8 sps:$4 sm:$0xff]   ;;  %v1563_v35 = vld [vmem:[%s2263_s0 + $0x154] ss:$8 sps:$4 sm:$0xff]   ;;  %v1565_v36 = vld [vmem:[%s2263_s0 + $0x50] ss:$8 sps:$4 sm:$0xff]  }
   0xd   :  { %v1566_v37 = vld [vmem:[%s2263_s0 + $0x150] ss:$8 sps:$4 sm:$0xff]   ;;  %v1567_v38 = vld [vmem:[%s2263_s0 + $0x64] ss:$8 sps:$4 sm:$0xff]   ;;  %v1571_v40 = vld [vmem:[%s2263_s0 + $0x60] ss:$8 sps:$4 sm:$0xff]  }
   0xe   :  { %582 = vmatpush1.bf16.msra.mxu0 %v1521_v4  ;;  %1507 = vmatpush1.bf16.msra.mxu1 %v1521_v4  ;;  %v1569_v39 = vld [vmem:[%s2263_s0 + $0x164] ss:$8 sps:$4 sm:$0xff]   ;;  %v1572_v41 = vld [vmem:[%s2263_s0 + $0x160] ss:$8 sps:$4 sm:$0xff]   ;;  %v1573_v42 = vld [vmem:[%s2263_s0 + $0x74] ss:$8 sps:$4 sm:$0xff]  }
   0xf   :  { %583 = vmatprep.subr.bf16.mxu0 %v1627_v0  ;;  %1495 = vmatprep.subr.bf16.mxu1 %v1627_v0  ;;  %v1575_v43 = vld [vmem:[%s2263_s0 + $0x174] ss:$8 sps:$4 sm:$0xff]   ;;  %v1577_v44 = vld [vmem:[%s2263_s0 + $0x70] ss:$8 sps:$4 sm:$0xff]   ;;  %v1579_v46 = vld [vmem:[%s2263_s0 + $0x84] ss:$8 sps:$4 sm:$0xff]  }
  0x10   :  { %v1578_v45 = vld [vmem:[%s2263_s0 + $0x170] ss:$8 sps:$4 sm:$0xff]   ;;  %v1581_v47 = vld [vmem:[%s2263_s0 + $0x184] ss:$8 sps:$4 sm:$0xff]   ;;  %v1583_v48 = vld [vmem:[%s2263_s0 + $0x80] ss:$8 sps:$4 sm:$0xff]  }
  0x11   :  { %v1584_v49 = vld [vmem:[%s2263_s0 + $0x180] ss:$8 sps:$4 sm:$0xff]   ;;  %v1585_v50 = vld [vmem:[%s2263_s0 + $0x94] ss:$8 sps:$4 sm:$0xff]   ;;  %v1589_v52 = vld [vmem:[%s2263_s0 + $0x90] ss:$8 sps:$4 sm:$0xff]  }
  0x12   :  { %584 = vmatpush1.bf16.msra.mxu0 %v1522_v5  ;;  %1508 = vmatpush1.bf16.msra.mxu1 %v1522_v5  ;;  %v1587_v51 = vld [vmem:[%s2263_s0 + $0x194] ss:$8 sps:$4 sm:$0xff]   ;;  %v1590_v53 = vld [vmem:[%s2263_s0 + $0x190] ss:$8 sps:$4 sm:$0xff]   ;;  %v1591_v54 = vld [vmem:[%s2263_s0 + $0xa4] ss:$8 sps:$4 sm:$0xff]  }
  0x13   :  { %585 = vmatprep.subr.bf16.mxu0 %v1627_v0  ;;  %1496 = vmatprep.subr.bf16.mxu1 %v1627_v0  ;;  %v1593_v55 = vld [vmem:[%s2263_s0 + $0x1a4] ss:$8 sps:$4 sm:$0xff]   ;;  %v1595_v56 = vld [vmem:[%s2263_s0 + $0xa0] ss:$8 sps:$4 sm:$0xff]   ;;  %v1597_v58 = vld [vmem:[%s2263_s0 + $0xb4] ss:$8 sps:$4 sm:$0xff]  }
  0x14   :  { %v1596_v57 = vld [vmem:[%s2263_s0 + $0x1a0] ss:$8 sps:$4 sm:$0xff]   ;;  %v1599_v59 = vld [vmem:[%s2263_s0 + $0x1b4] ss:$8 sps:$4 sm:$0xff]   ;;  %v1601_v60 = vld [vmem:[%s2263_s0 + $0xb0] ss:$8 sps:$4 sm:$0xff]  }
  0x15   :  { %v1602_v61 = vld [vmem:[%s2263_s0 + $0x1b0] ss:$8 sps:$4 sm:$0xff]   ;;  %v1603_v62 = vld [vmem:[%s2263_s0 + $0xc4] ss:$8 sps:$4 sm:$0xff]   ;;  %v1608_v1 = vld [vmem:[%s2263_s0 + $0x1c0] ss:$8 sps:$4 sm:$0xff]  }
  0x16   :  { %586 = vmatpush1.bf16.msra.mxu0 %v1523_v8  ;;  %1509 = vmatpush1.bf16.msra.mxu1 %v1523_v8  ;;  %v1605_v63 = vld [vmem:[%s2263_s0 + $0x1c4] ss:$8 sps:$4 sm:$0xff]   ;;  %v1609_v2 = vld [vmem:[%s2263_s0 + $0xd4] ss:$8 sps:$4 sm:$0xff]   ;;  %v1613_v4 = vld [vmem:[%s2263_s0 + $0xd0] ss:$8 sps:$4 sm:$0xff]  }
  0x17   :  { %587 = vmatprep.subr.bf16.mxu0 %v1627_v0  ;;  %1497 = vmatprep.subr.bf16.mxu1 %v1627_v0  ;;  %v1611_v3 = vld [vmem:[%s2263_s0 + $0x1d4] ss:$8 sps:$4 sm:$0xff]   ;;  %v1614_v5 = vld [vmem:[%s2263_s0 + $0x1d0] ss:$8 sps:$4 sm:$0xff]   ;;  %v1615_v6 = vld [vmem:[%s2263_s0 + $0xe4] ss:$8 sps:$4 sm:$0xff]  }
  0x18   :  { %v1617_v7 = vld [vmem:[%s2263_s0 + $0x1e4] ss:$8 sps:$4 sm:$0xff]   ;;  %v1619_v8 = vld [vmem:[%s2263_s0 + $0xe0] ss:$8 sps:$4 sm:$0xff]  }
  0x1a   :  { %588 = vmatpush1.bf16.msra.mxu0 %v1524_v9  ;;  %1510 = vmatpush1.bf16.msra.mxu1 %v1524_v9  ;;  %v1620_v9 = vld [vmem:[%s2263_s0 + $0x1e0] ss:$8 sps:$4 sm:$0xff]  }
  0x1b   :  { %589 = vmatprep.subr.bf16.mxu0 %v1627_v0  ;;  %1498 = vmatprep.subr.bf16.mxu1 %v1627_v0 }
  0x1e   :  { %590 = vmatpush1.bf16.msra.mxu0 %v1525_v10  ;;  %1511 = vmatpush1.bf16.msra.mxu1 %v1525_v10  ;;  %v1621_v10 = vld [vmem:[%s2263_s0 + $0xf4] ss:$8 sps:$4 sm:$0xff]  }
  0x1f   :  { %591 = vmatprep.subr.bf16.mxu0 %v1627_v0  ;;  %1499 = vmatprep.subr.bf16.mxu1 %v1627_v0 }
  0x22   :  { %592 = vmatpush1.bf16.msra.mxu0 %v1526_v11  ;;  %1512 = vmatpush1.bf16.msra.mxu1 %v1526_v11  ;;  %v1623_v11 = vld [vmem:[%s2263_s0 + $0x1f4] ss:$8 sps:$4 sm:$0xff]  }
  0x23   :  { %593 = vmatprep.subr.bf16.mxu0 %v1627_v0  ;;  %1500 = vmatprep.subr.bf16.mxu1 %v1627_v0 }
  0x26   :  { %594 = vmatpush1.bf16.msra.mxu0 %v1527_v12  ;;  %1513 = vmatpush1.bf16.msra.mxu1 %v1527_v12  ;;  %v1625_v12 = vld [vmem:[%s2263_s0 + $0xf0] ss:$8 sps:$4 sm:$0xff]  }
  0x27   :  { %595 = vmatprep.subr.bf16.mxu0 %v1627_v0  ;;  %1501 = vmatprep.subr.bf16.mxu1 %v1627_v0 }
  0x2a   :  { %596 = vmatpush1.bf16.msra.mxu0 %v1528_v13  ;;  %1514 = vmatpush1.bf16.msra.mxu1 %v1528_v13  ;;  %v1626_v13 = vld [vmem:[%s2263_s0 + $0x1f0] ss:$8 sps:$4 sm:$0xff]  }
  0x2b   :  { %597 = vmatprep.subr.bf16.mxu0 %v1627_v0  ;;  %1502 = vmatprep.subr.bf16.mxu1 %v1627_v0 }
  0x2e   :  { %598 = vmatpush1.bf16.msra.mxu0 %v1529_v14  ;;  %1515 = vmatpush1.bf16.msra.mxu1 %v1529_v14  ;;  %v1940_v14 = vld [vmem:[%s2264_s2] ss:$0 sm:$0xff] }
  0x2f   :  { %599 = vmatprep.subr.bf16.mxu0 %v1627_v0  ;;  %1503 = vmatprep.subr.bf16.mxu1 %v1627_v0  ;;  %v1607_v0 = vld [vmem:[%s2263_s0 + $0xc0] ss:$8 sps:$4 sm:$0xff]  }
  0x32   :  { %600 = vmatpush1.bf16.msra.mxu0 %v1530_v15  ;;  %1516 = vmatpush1.bf16.msra.mxu1 %v1530_v15 }
  0x35   :  { %608 = vmatmul.mubr.bf16.vlgmr.msra.gmra.mrb[0].mxu0 %v1531_v16  ;;  %736 = vmatmul.mubr.bf16.vlgmr.msra.gmra.mrb[0].mxu1 %v1534_v17 }
  0x36   :  { %1332 = vmatprep.mubr.msk.bf16.mxu0 %vm478_vm0, %v1537_v18  ;;  %1348 = vmatprep.mubr.msk.bf16.mxu1 %vm478_vm0, %v1539_v19 }
  0x3d   :  { %616 = vmatmul.mubr.bf16.gmra.mrb[4].mxu0 %v1541_v20  ;;  %744 = vmatmul.mubr.bf16.gmra.mrb[4].mxu1 %v1542_v21 }
  0x3e   :  { %1333 = vmatprep.mubr.msk.bf16.mxu0 %vm478_vm0, %v1543_v22  ;;  %1349 = vmatprep.mubr.msk.bf16.mxu1 %vm478_vm0, %v1545_v23 }
  0x45   :  { %624 = vmatmul.mubr.bf16.gmra.mrb[8].mxu0 %v1547_v24  ;;  %752 = vmatmul.mubr.bf16.gmra.mrb[8].mxu1 %v1548_v25 }
  0x46   :  { %1334 = vmatprep.mubr.msk.bf16.mxu0 %vm478_vm0, %v1549_v26  ;;  %1350 = vmatprep.mubr.msk.bf16.mxu1 %vm478_vm0, %v1551_v27 }
  0x4d   :  { %632 = vmatmul.mubr.bf16.gmra.mrb[12].mxu0 %v1553_v28  ;;  %760 = vmatmul.mubr.bf16.gmra.mrb[12].mxu1 %v1554_v29 }
  0x4e   :  { %1335 = vmatprep.mubr.msk.bf16.mxu0 %vm478_vm0, %v1555_v30  ;;  %1351 = vmatprep.mubr.msk.bf16.mxu1 %vm478_vm0, %v1557_v31 }
  0x55   :  { %640 = vmatmul.mubr.bf16.gmra.mrb[16].mxu0 %v1559_v32  ;;  %768 = vmatmul.mubr.bf16.gmra.mrb[16].mxu1 %v1560_v33 }
  0x56   :  { %1336 = vmatprep.mubr.msk.bf16.mxu0 %vm478_vm0, %v1561_v34  ;;  %1352 = vmatprep.mubr.msk.bf16.mxu1 %vm478_vm0, %v1563_v35 }
  0x5d   :  { %648 = vmatmul.mubr.bf16.gmra.mrb[20].mxu0 %v1565_v36  ;;  %776 = vmatmul.mubr.bf16.gmra.mrb[20].mxu1 %v1566_v37 }
  0x5e   :  { %1337 = vmatprep.mubr.msk.bf16.mxu0 %vm478_vm0, %v1567_v38  ;;  %1353 = vmatprep.mubr.msk.bf16.mxu1 %vm478_vm0, %v1569_v39 }
  0x65   :  { %656 = vmatmul.mubr.bf16.gmra.mrb[24].mxu0 %v1571_v40  ;;  %784 = vmatmul.mubr.bf16.gmra.mrb[24].mxu1 %v1572_v41 }
  0x66   :  { %1338 = vmatprep.mubr.msk.bf16.mxu0 %vm478_vm0, %v1573_v42  ;;  %1354 = vmatprep.mubr.msk.bf16.mxu1 %vm478_vm0, %v1575_v43 }
  0x6d   :  { %664 = vmatmul.mubr.bf16.gmra.mrb[28].mxu0 %v1577_v44  ;;  %792 = vmatmul.mubr.bf16.gmra.mrb[28].mxu1 %v1578_v45 }
  0x6e   :  { %1339 = vmatprep.mubr.msk.bf16.mxu0 %vm478_vm0, %v1579_v46  ;;  %1355 = vmatprep.mubr.msk.bf16.mxu1 %vm478_vm0, %v1581_v47 }
  0x75   :  { %672 = vmatmul.mubr.bf16.gmra.mrb[32].mxu0 %v1583_v48  ;;  %800 = vmatmul.mubr.bf16.gmra.mrb[32].mxu1 %v1584_v49 }
  0x76   :  { %1340 = vmatprep.mubr.msk.bf16.mxu0 %vm478_vm0, %v1585_v50  ;;  %1356 = vmatprep.mubr.msk.bf16.mxu1 %vm478_vm0, %v1587_v51 }
  0x7d   :  { %680 = vmatmul.mubr.bf16.gmra.mrb[36].mxu0 %v1589_v52  ;;  %808 = vmatmul.mubr.bf16.gmra.mrb[36].mxu1 %v1590_v53 }
  0x7e   :  { %1341 = vmatprep.mubr.msk.bf16.mxu0 %vm478_vm0, %v1591_v54  ;;  %1357 = vmatprep.mubr.msk.bf16.mxu1 %vm478_vm0, %v1593_v55 }
  0x85   :  { %688 = vmatmul.mubr.bf16.gmra.mrb[40].mxu0 %v1595_v56  ;;  %816 = vmatmul.mubr.bf16.gmra.mrb[40].mxu1 %v1596_v57 }
  0x86   :  { %1342 = vmatprep.mubr.msk.bf16.mxu0 %vm478_vm0, %v1597_v58  ;;  %1358 = vmatprep.mubr.msk.bf16.mxu1 %vm478_vm0, %v1599_v59 }
  0x8d   :  { %696 = vmatmul.mubr.bf16.gmra.mrb[44].mxu0 %v1601_v60  ;;  %824 = vmatmul.mubr.bf16.gmra.mrb[44].mxu1 %v1602_v61 }
  0x8e   :  { %1343 = vmatprep.mubr.msk.bf16.mxu0 %vm478_vm0, %v1603_v62  ;;  %1359 = vmatprep.mubr.msk.bf16.mxu1 %vm478_vm0, %v1605_v63 }
  0x95   :  { %704 = vmatmul.mubr.bf16.gmra.mrb[48].mxu0 %v1607_v0  ;;  %832 = vmatmul.mubr.bf16.gmra.mrb[48].mxu1 %v1608_v1 }
  0x96   :  { %1344 = vmatprep.mubr.msk.bf16.mxu0 %vm478_vm0, %v1609_v2  ;;  %1360 = vmatprep.mubr.msk.bf16.mxu1 %vm478_vm0, %v1611_v3 }
  0x9d   :  { %712 = vmatmul.mubr.bf16.gmra.mrb[52].mxu0 %v1613_v4  ;;  %840 = vmatmul.mubr.bf16.gmra.mrb[52].mxu1 %v1614_v5 }
  0x9e   :  { %1345 = vmatprep.mubr.msk.bf16.mxu0 %vm478_vm0, %v1615_v6  ;;  %1361 = vmatprep.mubr.msk.bf16.mxu1 %vm478_vm0, %v1617_v7 }
  0xa5   :  { %720 = vmatmul.mubr.bf16.gmra.mrb[56].mxu0 %v1619_v8  ;;  %848 = vmatmul.mubr.bf16.gmra.mrb[56].mxu1 %v1620_v9 }
  0xa6   :  { %1346 = vmatprep.mubr.msk.bf16.mxu0 %vm478_vm0, %v1621_v10  ;;  %1362 = vmatprep.mubr.msk.bf16.mxu1 %vm478_vm0, %v1623_v11 }
  0xad   :  { %728 = vmatmul.mubr.bf16.gmra.mrb[60].mxu0 %v1625_v12  ;;  %856 = vmatmul.mubr.bf16.gmra.mrb[60].mxu1 %v1626_v13 }
 0x108   :  { %v609_v15 = vpop.f32.mrb[0].mxu0  ;;  %v737_v16 = vpop.f32.mrb[0].mxu1 }
 0x109   :  { %v610_v17 = vadd.f32 %v1940_v14, %v609_v15  ;;  %v738_v18 = vadd.f32 %v1940_v14, %v737_v16  ;;  %v611_v19 = vpop.f32.mrb[1].mxu0  ;;  %v739_v20 = vpop.f32.mrb[1].mxu1 }
 0x10a   :  { %v612_v21 = vpop.f32.mrb[2].mxu0  ;;  %v740_v22 = vpop.f32.mrb[2].mxu1 }
 0x10b   :  { %v864_v23 = vmax.f32 %v610_v17, 0.0  ;;  %v896_v24 = vmax.f32 %v738_v18, 0.0  ;;  %v613_v25 = vadd.f32 %v1940_v14, %v612_v21  ;;  %v741_v26 = vadd.f32 %v1940_v14, %v740_v22  ;;  %v614_v27 = vpop.f32.mrb[3].mxu0  ;;  %v742_v28 = vpop.f32.mrb[3].mxu1 }
 0x10d   :  { %v1427_v29 = vpack.c.bf16 %v864_v23, %v864_v23  ;;  %v1459_v30 = vpack.c.bf16 %v896_v24, %v896_v24  ;;  %v865_v31 = vmax.f32 %v613_v25, 0.0  ;;  %v897_v32 = vmax.f32 %v741_v26, 0.0 }
 0x10f   :  { %1185 = vst.msk [vmem:[%s2265_s3] sm:$0xf] %vm1184_vm1, %v1427_v29  ;;  %1217 = vst.msk [vmem:[%s2265_s3 + $0x80] sm:$0xf] %vm1184_vm1, %v1459_v30  ;;  %v1428_v33 = vpack.c.bf16 %v865_v31, %v865_v31  ;;  %v1460_v34 = vpack.c.bf16 %v897_v32, %v897_v32 }
 0x110   :  { %v617_v35 = vpop.f32.mrb[4].mxu0  ;;  %v745_v36 = vpop.f32.mrb[4].mxu1 }
 0x111   :  { %1186 = vst.msk [vmem:[%s2265_s3 + $0x4] sm:$0xf] %vm1184_vm1, %v1428_v33  ;;  %1218 = vst.msk [vmem:[%s2265_s3 + $0x84] sm:$0xf] %vm1184_vm1, %v1460_v34  ;;  %v618_v37 = vadd.f32 %v1940_v14, %v617_v35  ;;  %v746_v38 = vadd.f32 %v1940_v14, %v745_v36  ;;  %v619_v39 = vpop.f32.mrb[5].mxu0  ;;  %v747_v40 = vpop.f32.mrb[5].mxu1 }
 0x112   :  { %v620_v41 = vpop.f32.mrb[6].mxu0  ;;  %v748_v42 = vpop.f32.mrb[6].mxu1 }
 0x113   :  { %v866_v43 = vmax.f32 %v618_v37, 0.0  ;;  %v898_v44 = vmax.f32 %v746_v38, 0.0  ;;  %v621_v45 = vadd.f32 %v1940_v14, %v620_v41  ;;  %v749_v46 = vadd.f32 %v1940_v14, %v748_v42  ;;  %v622_v47 = vpop.f32.mrb[7].mxu0  ;;  %v750_v48 = vpop.f32.mrb[7].mxu1 }
 0x115   :  { %v1429_v49 = vpack.c.bf16 %v866_v43, %v866_v43  ;;  %v1461_v50 = vpack.c.bf16 %v898_v44, %v898_v44  ;;  %v867_v51 = vmax.f32 %v621_v45, 0.0  ;;  %v899_v52 = vmax.f32 %v749_v46, 0.0 }
 0x117   :  { %1187 = vst.msk [vmem:[%s2265_s3 + $0x8] sm:$0xf] %vm1184_vm1, %v1429_v49  ;;  %1219 = vst.msk [vmem:[%s2265_s3 + $0x88] sm:$0xf] %vm1184_vm1, %v1461_v50  ;;  %v1430_v53 = vpack.c.bf16 %v867_v51, %v867_v51  ;;  %v1462_v54 = vpack.c.bf16 %v899_v52, %v899_v52 }
 0x118   :  { %v625_v55 = vpop.f32.mrb[8].mxu0  ;;  %v753_v56 = vpop.f32.mrb[8].mxu1 }
 0x119   :  { %1188 = vst.msk [vmem:[%s2265_s3 + $0xc] sm:$0xf] %vm1184_vm1, %v1430_v53  ;;  %1220 = vst.msk [vmem:[%s2265_s3 + $0x8c] sm:$0xf] %vm1184_vm1, %v1462_v54  ;;  %v626_v57 = vadd.f32 %v1940_v14, %v625_v55  ;;  %v754_v58 = vadd.f32 %v1940_v14, %v753_v56  ;;  %v627_v59 = vpop.f32.mrb[9].mxu0  ;;  %v755_v60 = vpop.f32.mrb[9].mxu1 }
 0x11a   :  { %v628_v61 = vpop.f32.mrb[10].mxu0  ;;  %v756_v62 = vpop.f32.mrb[10].mxu1 }
 0x11b   :  { %v868_v63 = vmax.f32 %v626_v57, 0.0  ;;  %v900_v0 = vmax.f32 %v754_v58, 0.0  ;;  %v629_v1 = vadd.f32 %v1940_v14, %v628_v61  ;;  %v757_v2 = vadd.f32 %v1940_v14, %v756_v62  ;;  %v630_v3 = vpop.f32.mrb[11].mxu0  ;;  %v758_v4 = vpop.f32.mrb[11].mxu1 }
 0x11d   :  { %v1431_v5 = vpack.c.bf16 %v868_v63, %v868_v63  ;;  %v1463_v6 = vpack.c.bf16 %v900_v0, %v900_v0  ;;  %v869_v7 = vmax.f32 %v629_v1, 0.0  ;;  %v901_v8 = vmax.f32 %v757_v2, 0.0 }
 0x11f   :  { %1189 = vst.msk [vmem:[%s2265_s3 + $0x10] sm:$0xf] %vm1184_vm1, %v1431_v5  ;;  %1221 = vst.msk [vmem:[%s2265_s3 + $0x90] sm:$0xf] %vm1184_vm1, %v1463_v6  ;;  %v1432_v9 = vpack.c.bf16 %v869_v7, %v869_v7  ;;  %v1464_v10 = vpack.c.bf16 %v901_v8, %v901_v8 }
 0x120   :  { %v633_v11 = vpop.f32.mrb[12].mxu0  ;;  %v761_v12 = vpop.f32.mrb[12].mxu1 }
 0x121   :  { %1190 = vst.msk [vmem:[%s2265_s3 + $0x14] sm:$0xf] %vm1184_vm1, %v1432_v9  ;;  %1222 = vst.msk [vmem:[%s2265_s3 + $0x94] sm:$0xf] %vm1184_vm1, %v1464_v10  ;;  %v634_v13 = vadd.f32 %v1940_v14, %v633_v11  ;;  %v762_v15 = vadd.f32 %v1940_v14, %v761_v12  ;;  %v635_v16 = vpop.f32.mrb[13].mxu0  ;;  %v763_v17 = vpop.f32.mrb[13].mxu1 }
 0x122   :  { %v636_v18 = vpop.f32.mrb[14].mxu0  ;;  %v764_v19 = vpop.f32.mrb[14].mxu1 }
 0x123   :  { %v870_v20 = vmax.f32 %v634_v13, 0.0  ;;  %v902_v21 = vmax.f32 %v762_v15, 0.0  ;;  %v637_v22 = vadd.f32 %v1940_v14, %v636_v18  ;;  %v765_v23 = vadd.f32 %v1940_v14, %v764_v19  ;;  %v638_v24 = vpop.f32.mrb[15].mxu0  ;;  %v766_v25 = vpop.f32.mrb[15].mxu1 }
 0x125   :  { %v1433_v26 = vpack.c.bf16 %v870_v20, %v870_v20  ;;  %v1465_v27 = vpack.c.bf16 %v902_v21, %v902_v21  ;;  %v871_v28 = vmax.f32 %v637_v22, 0.0  ;;  %v903_v29 = vmax.f32 %v765_v23, 0.0 }
 0x127   :  { %1191 = vst.msk [vmem:[%s2265_s3 + $0x18] sm:$0xf] %vm1184_vm1, %v1433_v26  ;;  %1223 = vst.msk [vmem:[%s2265_s3 + $0x98] sm:$0xf] %vm1184_vm1, %v1465_v27  ;;  %v1434_v30 = vpack.c.bf16 %v871_v28, %v871_v28  ;;  %v1466_v31 = vpack.c.bf16 %v903_v29, %v903_v29 }
 0x128   :  { %v641_v32 = vpop.f32.mrb[16].mxu0  ;;  %v769_v33 = vpop.f32.mrb[16].mxu1 }
 0x129   :  { %1192 = vst.msk [vmem:[%s2265_s3 + $0x1c] sm:$0xf] %vm1184_vm1, %v1434_v30  ;;  %1224 = vst.msk [vmem:[%s2265_s3 + $0x9c] sm:$0xf] %vm1184_vm1, %v1466_v31  ;;  %v642_v34 = vadd.f32 %v1940_v14, %v641_v32  ;;  %v770_v35 = vadd.f32 %v1940_v14, %v769_v33  ;;  %v643_v36 = vpop.f32.mrb[17].mxu0  ;;  %v771_v37 = vpop.f32.mrb[17].mxu1 }
 0x12a   :  { %v644_v38 = vpop.f32.mrb[18].mxu0  ;;  %v772_v39 = vpop.f32.mrb[18].mxu1 }
 0x12b   :  { %v872_v40 = vmax.f32 %v642_v34, 0.0  ;;  %v904_v41 = vmax.f32 %v770_v35, 0.0  ;;  %v645_v42 = vadd.f32 %v1940_v14, %v644_v38  ;;  %v773_v43 = vadd.f32 %v1940_v14, %v772_v39  ;;  %v646_v44 = vpop.f32.mrb[19].mxu0  ;;  %v774_v45 = vpop.f32.mrb[19].mxu1 }
 0x12d   :  { %v1435_v46 = vpack.c.bf16 %v872_v40, %v872_v40  ;;  %v1467_v47 = vpack.c.bf16 %v904_v41, %v904_v41  ;;  %v873_v48 = vmax.f32 %v645_v42, 0.0  ;;  %v905_v49 = vmax.f32 %v773_v43, 0.0 }
 0x12f   :  { %1193 = vst.msk [vmem:[%s2265_s3 + $0x20] sm:$0xf] %vm1184_vm1, %v1435_v46  ;;  %1225 = vst.msk [vmem:[%s2265_s3 + $0xa0] sm:$0xf] %vm1184_vm1, %v1467_v47  ;;  %v1436_v50 = vpack.c.bf16 %v873_v48, %v873_v48  ;;  %v1468_v51 = vpack.c.bf16 %v905_v49, %v905_v49 }
 0x130   :  { %v649_v52 = vpop.f32.mrb[20].mxu0  ;;  %v777_v53 = vpop.f32.mrb[20].mxu1 }
 0x131   :  { %1194 = vst.msk [vmem:[%s2265_s3 + $0x24] sm:$0xf] %vm1184_vm1, %v1436_v50  ;;  %1226 = vst.msk [vmem:[%s2265_s3 + $0xa4] sm:$0xf] %vm1184_vm1, %v1468_v51  ;;  %v650_v54 = vadd.f32 %v1940_v14, %v649_v52  ;;  %v778_v55 = vadd.f32 %v1940_v14, %v777_v53  ;;  %v651_v56 = vpop.f32.mrb[21].mxu0  ;;  %v779_v57 = vpop.f32.mrb[21].mxu1 }
 0x132   :  { %v652_v58 = vpop.f32.mrb[22].mxu0  ;;  %v780_v59 = vpop.f32.mrb[22].mxu1 }
 0x133   :  { %v874_v60 = vmax.f32 %v650_v54, 0.0  ;;  %v906_v61 = vmax.f32 %v778_v55, 0.0  ;;  %v653_v62 = vadd.f32 %v1940_v14, %v652_v58  ;;  %v781_v63 = vadd.f32 %v1940_v14, %v780_v59  ;;  %v654_v0 = vpop.f32.mrb[23].mxu0  ;;  %v782_v1 = vpop.f32.mrb[23].mxu1 }
 0x135   :  { %v1437_v2 = vpack.c.bf16 %v874_v60, %v874_v60  ;;  %v1469_v3 = vpack.c.bf16 %v906_v61, %v906_v61  ;;  %v875_v4 = vmax.f32 %v653_v62, 0.0  ;;  %v907_v5 = vmax.f32 %v781_v63, 0.0 }
 0x137   :  { %1195 = vst.msk [vmem:[%s2265_s3 + $0x28] sm:$0xf] %vm1184_vm1, %v1437_v2  ;;  %1227 = vst.msk [vmem:[%s2265_s3 + $0xa8] sm:$0xf] %vm1184_vm1, %v1469_v3  ;;  %v1438_v6 = vpack.c.bf16 %v875_v4, %v875_v4  ;;  %v1470_v7 = vpack.c.bf16 %v907_v5, %v907_v5 }
 0x138   :  { %v657_v8 = vpop.f32.mrb[24].mxu0  ;;  %v785_v9 = vpop.f32.mrb[24].mxu1 }
 0x139   :  { %1196 = vst.msk [vmem:[%s2265_s3 + $0x2c] sm:$0xf] %vm1184_vm1, %v1438_v6  ;;  %1228 = vst.msk [vmem:[%s2265_s3 + $0xac] sm:$0xf] %vm1184_vm1, %v1470_v7  ;;  %v658_v10 = vadd.f32 %v1940_v14, %v657_v8  ;;  %v786_v11 = vadd.f32 %v1940_v14, %v785_v9  ;;  %v659_v12 = vpop.f32.mrb[25].mxu0  ;;  %v787_v13 = vpop.f32.mrb[25].mxu1 }
 0x13a   :  { %v660_v15 = vpop.f32.mrb[26].mxu0  ;;  %v788_v16 = vpop.f32.mrb[26].mxu1 }
 0x13b   :  { %v876_v17 = vmax.f32 %v658_v10, 0.0  ;;  %v908_v18 = vmax.f32 %v786_v11, 0.0  ;;  %v661_v19 = vadd.f32 %v1940_v14, %v660_v15  ;;  %v789_v20 = vadd.f32 %v1940_v14, %v788_v16  ;;  %v662_v21 = vpop.f32.mrb[27].mxu0  ;;  %v790_v22 = vpop.f32.mrb[27].mxu1 }
 0x13d   :  { %v1439_v23 = vpack.c.bf16 %v876_v17, %v876_v17  ;;  %v1471_v24 = vpack.c.bf16 %v908_v18, %v908_v18  ;;  %v877_v25 = vmax.f32 %v661_v19, 0.0  ;;  %v909_v26 = vmax.f32 %v789_v20, 0.0 }
 0x13f   :  { %1197 = vst.msk [vmem:[%s2265_s3 + $0x30] sm:$0xf] %vm1184_vm1, %v1439_v23  ;;  %1229 = vst.msk [vmem:[%s2265_s3 + $0xb0] sm:$0xf] %vm1184_vm1, %v1471_v24  ;;  %v1440_v27 = vpack.c.bf16 %v877_v25, %v877_v25  ;;  %v1472_v28 = vpack.c.bf16 %v909_v26, %v909_v26 }
 0x140   :  { %v665_v29 = vpop.f32.mrb[28].mxu0  ;;  %v793_v30 = vpop.f32.mrb[28].mxu1 }
 0x141   :  { %1198 = vst.msk [vmem:[%s2265_s3 + $0x34] sm:$0xf] %vm1184_vm1, %v1440_v27  ;;  %1230 = vst.msk [vmem:[%s2265_s3 + $0xb4] sm:$0xf] %vm1184_vm1, %v1472_v28  ;;  %v666_v31 = vadd.f32 %v1940_v14, %v665_v29  ;;  %v794_v32 = vadd.f32 %v1940_v14, %v793_v30  ;;  %v667_v33 = vpop.f32.mrb[29].mxu0  ;;  %v795_v34 = vpop.f32.mrb[29].mxu1 }
 0x142   :  { %v668_v35 = vpop.f32.mrb[30].mxu0  ;;  %v796_v36 = vpop.f32.mrb[30].mxu1 }
 0x143   :  { %v878_v37 = vmax.f32 %v666_v31, 0.0  ;;  %v910_v38 = vmax.f32 %v794_v32, 0.0  ;;  %v669_v39 = vadd.f32 %v1940_v14, %v668_v35  ;;  %v797_v40 = vadd.f32 %v1940_v14, %v796_v36  ;;  %v670_v41 = vpop.f32.mrb[31].mxu0  ;;  %v798_v42 = vpop.f32.mrb[31].mxu1 }
 0x145   :  { %v1441_v43 = vpack.c.bf16 %v878_v37, %v878_v37  ;;  %v1473_v44 = vpack.c.bf16 %v910_v38, %v910_v38  ;;  %v879_v45 = vmax.f32 %v669_v39, 0.0  ;;  %v911_v46 = vmax.f32 %v797_v40, 0.0 }
 0x147   :  { %1199 = vst.msk [vmem:[%s2265_s3 + $0x38] sm:$0xf] %vm1184_vm1, %v1441_v43  ;;  %1231 = vst.msk [vmem:[%s2265_s3 + $0xb8] sm:$0xf] %vm1184_vm1, %v1473_v44  ;;  %v1442_v47 = vpack.c.bf16 %v879_v45, %v879_v45  ;;  %v1474_v48 = vpack.c.bf16 %v911_v46, %v911_v46 }
 0x148   :  { %v673_v49 = vpop.f32.mrb[32].mxu0  ;;  %v801_v50 = vpop.f32.mrb[32].mxu1 }
 0x149   :  { %1200 = vst.msk [vmem:[%s2265_s3 + $0x3c] sm:$0xf] %vm1184_vm1, %v1442_v47  ;;  %1232 = vst.msk [vmem:[%s2265_s3 + $0xbc] sm:$0xf] %vm1184_vm1, %v1474_v48  ;;  %v674_v51 = vadd.f32 %v1940_v14, %v673_v49  ;;  %v802_v52 = vadd.f32 %v1940_v14, %v801_v50  ;;  %v675_v53 = vpop.f32.mrb[33].mxu0  ;;  %v803_v54 = vpop.f32.mrb[33].mxu1 }
 0x14a   :  { %v676_v55 = vpop.f32.mrb[34].mxu0  ;;  %v804_v56 = vpop.f32.mrb[34].mxu1 }
 0x14b   :  { %v880_v57 = vmax.f32 %v674_v51, 0.0  ;;  %v912_v58 = vmax.f32 %v802_v52, 0.0  ;;  %v677_v59 = vadd.f32 %v1940_v14, %v676_v55  ;;  %v805_v60 = vadd.f32 %v1940_v14, %v804_v56  ;;  %v678_v61 = vpop.f32.mrb[35].mxu0  ;;  %v806_v62 = vpop.f32.mrb[35].mxu1 }
 0x14d   :  { %v1443_v63 = vpack.c.bf16 %v880_v57, %v880_v57  ;;  %v1475_v0 = vpack.c.bf16 %v912_v58, %v912_v58  ;;  %v881_v1 = vmax.f32 %v677_v59, 0.0  ;;  %v913_v2 = vmax.f32 %v805_v60, 0.0 }
 0x14f   :  { %1201 = vst.msk [vmem:[%s2265_s3 + $0x40] sm:$0xf] %vm1184_vm1, %v1443_v63  ;;  %1233 = vst.msk [vmem:[%s2265_s3 + $0xc0] sm:$0xf] %vm1184_vm1, %v1475_v0  ;;  %v1444_v3 = vpack.c.bf16 %v881_v1, %v881_v1  ;;  %v1476_v4 = vpack.c.bf16 %v913_v2, %v913_v2 }
 0x150   :  { %v681_v5 = vpop.f32.mrb[36].mxu0  ;;  %v809_v6 = vpop.f32.mrb[36].mxu1 }
 0x151   :  { %1202 = vst.msk [vmem:[%s2265_s3 + $0x44] sm:$0xf] %vm1184_vm1, %v1444_v3  ;;  %1234 = vst.msk [vmem:[%s2265_s3 + $0xc4] sm:$0xf] %vm1184_vm1, %v1476_v4  ;;  %v682_v7 = vadd.f32 %v1940_v14, %v681_v5  ;;  %v810_v8 = vadd.f32 %v1940_v14, %v809_v6  ;;  %v683_v9 = vpop.f32.mrb[37].mxu0  ;;  %v811_v10 = vpop.f32.mrb[37].mxu1 }
 0x152   :  { %v684_v11 = vpop.f32.mrb[38].mxu0  ;;  %v812_v12 = vpop.f32.mrb[38].mxu1 }
 0x153   :  { %v882_v13 = vmax.f32 %v682_v7, 0.0  ;;  %v914_v15 = vmax.f32 %v810_v8, 0.0  ;;  %v685_v16 = vadd.f32 %v1940_v14, %v684_v11  ;;  %v813_v17 = vadd.f32 %v1940_v14, %v812_v12  ;;  %v686_v18 = vpop.f32.mrb[39].mxu0  ;;  %v814_v19 = vpop.f32.mrb[39].mxu1 }
 0x155   :  { %v1445_v20 = vpack.c.bf16 %v882_v13, %v882_v13  ;;  %v1477_v21 = vpack.c.bf16 %v914_v15, %v914_v15  ;;  %v883_v22 = vmax.f32 %v685_v16, 0.0  ;;  %v915_v23 = vmax.f32 %v813_v17, 0.0 }
 0x157   :  { %1203 = vst.msk [vmem:[%s2265_s3 + $0x48] sm:$0xf] %vm1184_vm1, %v1445_v20  ;;  %1235 = vst.msk [vmem:[%s2265_s3 + $0xc8] sm:$0xf] %vm1184_vm1, %v1477_v21  ;;  %v1446_v24 = vpack.c.bf16 %v883_v22, %v883_v22  ;;  %v1478_v25 = vpack.c.bf16 %v915_v23, %v915_v23 }
 0x158   :  { %v689_v26 = vpop.f32.mrb[40].mxu0  ;;  %v817_v27 = vpop.f32.mrb[40].mxu1 }
 0x159   :  { %1204 = vst.msk [vmem:[%s2265_s3 + $0x4c] sm:$0xf] %vm1184_vm1, %v1446_v24  ;;  %1236 = vst.msk [vmem:[%s2265_s3 + $0xcc] sm:$0xf] %vm1184_vm1, %v1478_v25  ;;  %v690_v28 = vadd.f32 %v1940_v14, %v689_v26  ;;  %v818_v29 = vadd.f32 %v1940_v14, %v817_v27  ;;  %v691_v30 = vpop.f32.mrb[41].mxu0  ;;  %v819_v31 = vpop.f32.mrb[41].mxu1 }
 0x15a   :  { %v692_v32 = vpop.f32.mrb[42].mxu0  ;;  %v820_v33 = vpop.f32.mrb[42].mxu1 }
 0x15b   :  { %v884_v34 = vmax.f32 %v690_v28, 0.0  ;;  %v916_v35 = vmax.f32 %v818_v29, 0.0  ;;  %v693_v36 = vadd.f32 %v1940_v14, %v692_v32  ;;  %v821_v37 = vadd.f32 %v1940_v14, %v820_v33  ;;  %v694_v38 = vpop.f32.mrb[43].mxu0  ;;  %v822_v39 = vpop.f32.mrb[43].mxu1 }
 0x15d   :  { %v1447_v40 = vpack.c.bf16 %v884_v34, %v884_v34  ;;  %v1479_v41 = vpack.c.bf16 %v916_v35, %v916_v35  ;;  %v885_v42 = vmax.f32 %v693_v36, 0.0  ;;  %v917_v43 = vmax.f32 %v821_v37, 0.0 }
 0x15f   :  { %1205 = vst.msk [vmem:[%s2265_s3 + $0x50] sm:$0xf] %vm1184_vm1, %v1447_v40  ;;  %1237 = vst.msk [vmem:[%s2265_s3 + $0xd0] sm:$0xf] %vm1184_vm1, %v1479_v41  ;;  %v1448_v44 = vpack.c.bf16 %v885_v42, %v885_v42  ;;  %v1480_v45 = vpack.c.bf16 %v917_v43, %v917_v43 }
 0x160   :  { %v697_v46 = vpop.f32.mrb[44].mxu0  ;;  %v825_v47 = vpop.f32.mrb[44].mxu1 }
 0x161   :  { %1206 = vst.msk [vmem:[%s2265_s3 + $0x54] sm:$0xf] %vm1184_vm1, %v1448_v44  ;;  %1238 = vst.msk [vmem:[%s2265_s3 + $0xd4] sm:$0xf] %vm1184_vm1, %v1480_v45  ;;  %v698_v48 = vadd.f32 %v1940_v14, %v697_v46  ;;  %v826_v49 = vadd.f32 %v1940_v14, %v825_v47  ;;  %v699_v50 = vpop.f32.mrb[45].mxu0  ;;  %v827_v51 = vpop.f32.mrb[45].mxu1 }
 0x162   :  { %v700_v52 = vpop.f32.mrb[46].mxu0  ;;  %v828_v53 = vpop.f32.mrb[46].mxu1 }
 0x163   :  { %v886_v54 = vmax.f32 %v698_v48, 0.0  ;;  %v918_v55 = vmax.f32 %v826_v49, 0.0  ;;  %v701_v56 = vadd.f32 %v1940_v14, %v700_v52  ;;  %v829_v57 = vadd.f32 %v1940_v14, %v828_v53  ;;  %v702_v58 = vpop.f32.mrb[47].mxu0  ;;  %v830_v59 = vpop.f32.mrb[47].mxu1 }
 0x165   :  { %v1449_v60 = vpack.c.bf16 %v886_v54, %v886_v54  ;;  %v1481_v61 = vpack.c.bf16 %v918_v55, %v918_v55  ;;  %v887_v62 = vmax.f32 %v701_v56, 0.0  ;;  %v919_v63 = vmax.f32 %v829_v57, 0.0 }
 0x167   :  { %1207 = vst.msk [vmem:[%s2265_s3 + $0x58] sm:$0xf] %vm1184_vm1, %v1449_v60  ;;  %1239 = vst.msk [vmem:[%s2265_s3 + $0xd8] sm:$0xf] %vm1184_vm1, %v1481_v61  ;;  %v1450_v0 = vpack.c.bf16 %v887_v62, %v887_v62  ;;  %v1482_v1 = vpack.c.bf16 %v919_v63, %v919_v63 }
 0x168   :  { %v705_v2 = vpop.f32.mrb[48].mxu0  ;;  %v833_v3 = vpop.f32.mrb[48].mxu1 }
 0x169   :  { %1208 = vst.msk [vmem:[%s2265_s3 + $0x5c] sm:$0xf] %vm1184_vm1, %v1450_v0  ;;  %1240 = vst.msk [vmem:[%s2265_s3 + $0xdc] sm:$0xf] %vm1184_vm1, %v1482_v1  ;;  %v706_v4 = vadd.f32 %v1940_v14, %v705_v2  ;;  %v834_v5 = vadd.f32 %v1940_v14, %v833_v3  ;;  %v707_v6 = vpop.f32.mrb[49].mxu0  ;;  %v835_v7 = vpop.f32.mrb[49].mxu1 }
 0x16a   :  { %v708_v8 = vpop.f32.mrb[50].mxu0  ;;  %v836_v9 = vpop.f32.mrb[50].mxu1 }
 0x16b   :  { %v888_v10 = vmax.f32 %v706_v4, 0.0  ;;  %v920_v11 = vmax.f32 %v834_v5, 0.0  ;;  %v709_v12 = vadd.f32 %v1940_v14, %v708_v8  ;;  %v837_v13 = vadd.f32 %v1940_v14, %v836_v9  ;;  %v710_v15 = vpop.f32.mrb[51].mxu0  ;;  %v838_v16 = vpop.f32.mrb[51].mxu1 }
 0x16d   :  { %v1451_v17 = vpack.c.bf16 %v888_v10, %v888_v10  ;;  %v1483_v18 = vpack.c.bf16 %v920_v11, %v920_v11  ;;  %v889_v19 = vmax.f32 %v709_v12, 0.0  ;;  %v921_v20 = vmax.f32 %v837_v13, 0.0 }
 0x16f   :  { %1209 = vst.msk [vmem:[%s2265_s3 + $0x60] sm:$0xf] %vm1184_vm1, %v1451_v17  ;;  %1241 = vst.msk [vmem:[%s2265_s3 + $0xe0] sm:$0xf] %vm1184_vm1, %v1483_v18  ;;  %v1452_v21 = vpack.c.bf16 %v889_v19, %v889_v19  ;;  %v1484_v22 = vpack.c.bf16 %v921_v20, %v921_v20 }
 0x170   :  { %v713_v23 = vpop.f32.mrb[52].mxu0  ;;  %v841_v24 = vpop.f32.mrb[52].mxu1 }
 0x171   :  { %1210 = vst.msk [vmem:[%s2265_s3 + $0x64] sm:$0xf] %vm1184_vm1, %v1452_v21  ;;  %1242 = vst.msk [vmem:[%s2265_s3 + $0xe4] sm:$0xf] %vm1184_vm1, %v1484_v22  ;;  %v714_v25 = vadd.f32 %v1940_v14, %v713_v23  ;;  %v842_v26 = vadd.f32 %v1940_v14, %v841_v24  ;;  %v715_v27 = vpop.f32.mrb[53].mxu0  ;;  %v843_v28 = vpop.f32.mrb[53].mxu1 }
 0x172   :  { %v716_v29 = vpop.f32.mrb[54].mxu0  ;;  %v844_v30 = vpop.f32.mrb[54].mxu1 }
 0x173   :  { %v890_v31 = vmax.f32 %v714_v25, 0.0  ;;  %v922_v32 = vmax.f32 %v842_v26, 0.0  ;;  %v717_v33 = vadd.f32 %v1940_v14, %v716_v29  ;;  %v845_v34 = vadd.f32 %v1940_v14, %v844_v30  ;;  %v718_v35 = vpop.f32.mrb[55].mxu0  ;;  %v846_v36 = vpop.f32.mrb[55].mxu1 }
 0x175   :  { %v1453_v37 = vpack.c.bf16 %v890_v31, %v890_v31  ;;  %v1485_v38 = vpack.c.bf16 %v922_v32, %v922_v32  ;;  %v891_v39 = vmax.f32 %v717_v33, 0.0  ;;  %v923_v40 = vmax.f32 %v845_v34, 0.0 }
 0x177   :  { %1211 = vst.msk [vmem:[%s2265_s3 + $0x68] sm:$0xf] %vm1184_vm1, %v1453_v37  ;;  %1243 = vst.msk [vmem:[%s2265_s3 + $0xe8] sm:$0xf] %vm1184_vm1, %v1485_v38  ;;  %v1454_v41 = vpack.c.bf16 %v891_v39, %v891_v39  ;;  %v1486_v42 = vpack.c.bf16 %v923_v40, %v923_v40 }
 0x178   :  { %v721_v43 = vpop.f32.mrb[56].mxu0  ;;  %v849_v44 = vpop.f32.mrb[56].mxu1 }
 0x179   :  { %1212 = vst.msk [vmem:[%s2265_s3 + $0x6c] sm:$0xf] %vm1184_vm1, %v1454_v41  ;;  %1244 = vst.msk [vmem:[%s2265_s3 + $0xec] sm:$0xf] %vm1184_vm1, %v1486_v42  ;;  %v722_v45 = vadd.f32 %v1940_v14, %v721_v43  ;;  %v850_v46 = vadd.f32 %v1940_v14, %v849_v44  ;;  %v723_v47 = vpop.f32.mrb[57].mxu0  ;;  %v851_v48 = vpop.f32.mrb[57].mxu1 }
 0x17a   :  { %v724_v49 = vpop.f32.mrb[58].mxu0  ;;  %v852_v50 = vpop.f32.mrb[58].mxu1 }
 0x17b   :  { %v892_v51 = vmax.f32 %v722_v45, 0.0  ;;  %v924_v52 = vmax.f32 %v850_v46, 0.0  ;;  %v725_v53 = vadd.f32 %v1940_v14, %v724_v49  ;;  %v853_v54 = vadd.f32 %v1940_v14, %v852_v50  ;;  %v726_v55 = vpop.f32.mrb[59].mxu0  ;;  %v854_v56 = vpop.f32.mrb[59].mxu1 }
 0x17d   :  { %v1455_v57 = vpack.c.bf16 %v892_v51, %v892_v51  ;;  %v1487_v58 = vpack.c.bf16 %v924_v52, %v924_v52  ;;  %v893_v59 = vmax.f32 %v725_v53, 0.0  ;;  %v925_v60 = vmax.f32 %v853_v54, 0.0 }
 0x17f   :  { %1213 = vst.msk [vmem:[%s2265_s3 + $0x70] sm:$0xf] %vm1184_vm1, %v1455_v57  ;;  %1245 = vst.msk [vmem:[%s2265_s3 + $0xf0] sm:$0xf] %vm1184_vm1, %v1487_v58  ;;  %v1456_v61 = vpack.c.bf16 %v893_v59, %v893_v59  ;;  %v1488_v62 = vpack.c.bf16 %v925_v60, %v925_v60 }
 0x180   :  { %v729_v63 = vpop.f32.mrb[60].mxu0  ;;  %v857_v0 = vpop.f32.mrb[60].mxu1 }
 0x181   :  { %1214 = vst.msk [vmem:[%s2265_s3 + $0x74] sm:$0xf] %vm1184_vm1, %v1456_v61  ;;  %1246 = vst.msk [vmem:[%s2265_s3 + $0xf4] sm:$0xf] %vm1184_vm1, %v1488_v62  ;;  %v730_v1 = vadd.f32 %v1940_v14, %v729_v63  ;;  %v858_v2 = vadd.f32 %v1940_v14, %v857_v0  ;;  %v731_v3 = vpop.f32.mrb[61].mxu0  ;;  %v859_v4 = vpop.f32.mrb[61].mxu1 }
 0x182   :  { %v732_v5 = vpop.f32.mrb[62].mxu0  ;;  %v860_v6 = vpop.f32.mrb[62].mxu1 }
 0x183   :  { %v894_v7 = vmax.f32 %v730_v1, 0.0  ;;  %v926_v8 = vmax.f32 %v858_v2, 0.0  ;;  %v733_v9 = vadd.f32 %v1940_v14, %v732_v5  ;;  %v861_v10 = vadd.f32 %v1940_v14, %v860_v6  ;;  %v734_v11 = vpop.f32.mrb[63].mxu0  ;;  %v862_v12 = vpop.f32.mrb[63].mxu1 }
 0x185   :  { %v1457_v13 = vpack.c.bf16 %v894_v7, %v894_v7  ;;  %v1489_v15 = vpack.c.bf16 %v926_v8, %v926_v8  ;;  %v895_v16 = vmax.f32 %v733_v9, 0.0  ;;  %v927_v17 = vmax.f32 %v861_v10, 0.0 }
 0x187   :  { %1215 = vst.msk [vmem:[%s2265_s3 + $0x78] sm:$0xf] %vm1184_vm1, %v1457_v13  ;;  %1247 = vst.msk [vmem:[%s2265_s3 + $0xf8] sm:$0xf] %vm1184_vm1, %v1489_v15  ;;  %v1458_v18 = vpack.c.bf16 %v895_v16, %v895_v16  ;;  %v1490_v19 = vpack.c.bf16 %v927_v17, %v927_v17 }
 0x189   :  { %1216 = vst.msk [vmem:[%s2265_s3 + $0x7c] sm:$0xf] %vm1184_vm1, %v1458_v18  ;;  %1248 = vst.msk [vmem:[%s2265_s3 + $0xfc] sm:$0xf] %vm1184_vm1, %v1490_v19 }

// kernel: view_transform_get_cam_feats.4
= control target key start
LH: loop header
LB: loop body
LE: loop exit
PB: predicated region body
PF: predicated region fallthrough
CT: control target
= control target key end

     0   :  { %vm766_vm0 = vcmask 261120   ;;  %s2280_s1 = inlined_call_operand.vmem [shape: bf16[800,128], index: 1, kind: input, shape index: {}]   ;;  %s2281_s0 = inlined_call_operand.vmem [shape: bf16[128,800], index: 0, kind: input, shape index: {}]   ;;  %s2282_s2 = inlined_call_operand.vmem [shape: f32[1,128], index: 2, kind: input, shape index: {}]   ;;  %s2283_s3 = inlined_call_operand.vmem [shape: bf16[128,128], index: 3, kind: output, shape index: {}]  }
   0x1   :  { %v1711_v0 = vld [vmem:[%s2280_s1 + $0x40] sm:$0xff]   ;;  %v1715_v4 = vld [vmem:[%s2280_s1 + $0x48] sm:$0xff]   ;;  %v1719_v8 = vld [vmem:[%s2280_s1 + $0x50] sm:$0xff]  }
   0x2   :  { %v1712_v1 = vld [vmem:[%s2280_s1 + $0xc0] sm:$0xff]   ;;  %1473 = vmatprep.subr.bf16.mxu0 %v1711_v0  ;;  %v1716_v5 = vld [vmem:[%s2280_s1 + $0xc8] sm:$0xff]   ;;  %v1720_v9 = vld [vmem:[%s2280_s1 + $0xd0] sm:$0xff]  }
   0x3   :  { %v1713_v2 = vld [vmem:[%s2280_s1] sm:$0xff]   ;;  %1537 = vmatprep.subr.bf16.mxu1 %v1712_v1  ;;  %v1717_v6 = vld [vmem:[%s2280_s1 + $0x8] sm:$0xff]   ;;  %v1721_v10 = vld [vmem:[%s2280_s1 + $0x10] sm:$0xff]  }
   0x4   :  { %v1714_v3 = vld [vmem:[%s2280_s1 + $0x80] sm:$0xff]   ;;  %1474 = vmatpush3.bf16.msra.mxu0 %v1713_v2  ;;  %v1718_v7 = vld [vmem:[%s2280_s1 + $0x88] sm:$0xff]   ;;  %v1722_v11 = vld [vmem:[%s2280_s1 + $0x90] sm:$0xff]  }
   0x5   :  { %1538 = vmatpush3.bf16.msra.mxu1 %v1714_v3  ;;  %1475 = vmatprep.subr.bf16.mxu0 %v1715_v4  ;;  %v1723_v12 = vld [vmem:[%s2280_s1 + $0x58] sm:$0xff]   ;;  %v1727_v16 = vld [vmem:[%s2280_s1 + $0x60] sm:$0xff]   ;;  %v1731_v20 = vld [vmem:[%s2280_s1 + $0x68] sm:$0xff]  }
   0x6   :  { %1539 = vmatprep.subr.bf16.mxu1 %v1716_v5  ;;  %v1724_v13 = vld [vmem:[%s2280_s1 + $0xd8] sm:$0xff]   ;;  %v1728_v17 = vld [vmem:[%s2280_s1 + $0xe0] sm:$0xff]   ;;  %v1732_v21 = vld [vmem:[%s2280_s1 + $0xe8] sm:$0xff]  }
   0x7   :  { %v1725_v14 = vld [vmem:[%s2280_s1 + $0x18] sm:$0xff]   ;;  %v1729_v18 = vld [vmem:[%s2280_s1 + $0x20] sm:$0xff]   ;;  %v1733_v22 = vld [vmem:[%s2280_s1 + $0x28] sm:$0xff]  }
   0x8   :  { %1476 = vmatpush3.bf16.msra.mxu0 %v1717_v6  ;;  %v1726_v15 = vld [vmem:[%s2280_s1 + $0x98] sm:$0xff]   ;;  %v1730_v19 = vld [vmem:[%s2280_s1 + $0xa0] sm:$0xff]   ;;  %v1734_v23 = vld [vmem:[%s2280_s1 + $0xa8] sm:$0xff]  }
   0x9   :  { %1540 = vmatpush3.bf16.msra.mxu1 %v1718_v7  ;;  %1477 = vmatprep.subr.bf16.mxu0 %v1719_v8  ;;  %v1735_v24 = vld [vmem:[%s2280_s1 + $0x70] sm:$0xff]   ;;  %v1739_v28 = vld [vmem:[%s2280_s1 + $0x78] sm:$0xff]   ;;  %v1745_v33 = vld [vmem:[%s2281_s0 + $0x4] ss:$28 sps:$4 sm:$0xff]  }
   0xa   :  { %1541 = vmatprep.subr.bf16.mxu1 %v1720_v9  ;;  %v1736_v25 = vld [vmem:[%s2280_s1 + $0xf0] sm:$0xff]   ;;  %v1740_v29 = vld [vmem:[%s2280_s1 + $0xf8] sm:$0xff]   ;;  %v1746_v34 = vld [vmem:[%s2281_s0 + $0x8] ss:$28 sps:$4 sm:$0xff]   ;;  %823 = vmatprep.mubr.bf16.mxu0 %v1745_v33 }
   0xb   :  { %v1737_v26 = vld [vmem:[%s2280_s1 + $0x30] sm:$0xff]   ;;  %v1741_v30 = vld [vmem:[%s2280_s1 + $0x38] sm:$0xff]   ;;  %v1748_v35 = vld [vmem:[%s2281_s0 + $0xc] ss:$28 sps:$4 sm:$0xff]  }
   0xc   :  { %1478 = vmatpush3.bf16.msra.mxu0 %v1721_v10  ;;  %v1738_v27 = vld [vmem:[%s2280_s1 + $0xb0] sm:$0xff]   ;;  %v1742_v31 = vld [vmem:[%s2280_s1 + $0xb8] sm:$0xff]   ;;  %v1749_v36 = vld [vmem:[%s2280_s1 + $0x140] sm:$0xff]   ;;  %920 = vmatprep.mubr.bf16.mxu1 %v1748_v35 }
   0xd   :  { %1542 = vmatpush3.bf16.msra.mxu1 %v1722_v11  ;;  %1479 = vmatprep.subr.bf16.mxu0 %v1723_v12  ;;  %v1743_v32 = vld [vmem:[%s2281_s0] ss:$28 sps:$4 sm:$0xff]   ;;  %v1755_v40 = vld [vmem:[%s2281_s0 + $0x38] ss:$28 sps:$4 sm:$0xff]   ;;  %v1757_v42 = vld [vmem:[%s2280_s1 + $0x148] sm:$0xff]  }
   0xe   :  { %1543 = vmatprep.subr.bf16.mxu1 %v1724_v13  ;;  %v1750_v37 = vld [vmem:[%s2280_s1 + $0x100] sm:$0xff]   ;;  %v1751_v38 = vld [vmem:[%s2281_s0 + $0x3c] ss:$28 sps:$4 sm:$0xff]   ;;  %v1758_v43 = vld [vmem:[%s2280_s1 + $0x108] sm:$0xff]  }
   0xf   :  { %v1753_v39 = vld [vmem:[%s2281_s0 + $0x44] ss:$28 sps:$4 sm:$0xff]   ;;  %v1759_v44 = vld [vmem:[%s2281_s0 + $0x74] ss:$28 sps:$4 sm:$0xff]   ;;  %v1761_v45 = vld [vmem:[%s2281_s0 + $0x7c] ss:$28 sps:$4 sm:$0xff]  }
  0x10   :  { %1480 = vmatpush3.bf16.msra.mxu0 %v1725_v14  ;;  %v1756_v41 = vld [vmem:[%s2281_s0 + $0x40] ss:$28 sps:$4 sm:$0xff]   ;;  %v1765_v46 = vld [vmem:[%s2280_s1 + $0x150] sm:$0xff]   ;;  %v1767_v50 = vld [vmem:[%s2281_s0 + $0xac] ss:$28 sps:$4 sm:$0xff]  }
  0x11   :  { %1544 = vmatpush3.bf16.msra.mxu1 %v1726_v15  ;;  %1481 = vmatprep.subr.bf16.mxu0 %v1727_v16  ;;  %v1766_v47 = vld [vmem:[%s2280_s1 + $0x110] sm:$0xff]   ;;  %v1773_v52 = vld [vmem:[%s2280_s1 + $0x158] sm:$0xff]   ;;  %v1781_v54 = vld [vmem:[%s2280_s1 + $0x160] sm:$0xff]  }
  0x12   :  { %1545 = vmatprep.subr.bf16.mxu1 %v1728_v17  ;;  %v1763_v48 = vld [vmem:[%s2281_s0 + $0x70] ss:$28 sps:$4 sm:$0xff]   ;;  %v1764_v49 = vld [vmem:[%s2281_s0 + $0x78] ss:$28 sps:$4 sm:$0xff]   ;;  %v1782_v55 = vld [vmem:[%s2280_s1 + $0x120] sm:$0xff]  }
  0x13   :  { %v1769_v51 = vld [vmem:[%s2281_s0 + $0xb4] ss:$28 sps:$4 sm:$0xff]   ;;  %v1774_v53 = vld [vmem:[%s2280_s1 + $0x118] sm:$0xff]   ;;  %v1771_v56 = vld [vmem:[%s2281_s0 + $0xa8] ss:$28 sps:$4 sm:$0xff]  }
  0x14   :  { %1482 = vmatpush3.bf16.msra.mxu0 %v1729_v18  ;;  %v1772_v57 = vld [vmem:[%s2281_s0 + $0xb0] ss:$28 sps:$4 sm:$0xff]   ;;  %v1775_v58 = vld [vmem:[%s2281_s0 + $0xe4] ss:$28 sps:$4 sm:$0xff]   ;;  %v1783_v2 = vld [vmem:[%s2281_s0 + $0x11c] ss:$28 sps:$4 sm:$0xff]  }
  0x15   :  { %1546 = vmatpush3.bf16.msra.mxu1 %v1730_v19  ;;  %1483 = vmatprep.subr.bf16.mxu0 %v1731_v20  ;;  %v1777_v59 = vld [vmem:[%s2281_s0 + $0xec] ss:$28 sps:$4 sm:$0xff]   ;;  %v1779_v62 = vld [vmem:[%s2281_s0 + $0xe0] ss:$28 sps:$4 sm:$0xff]   ;;  %v1797_v0 = vld [vmem:[%s2280_s1 + $0x170] sm:$0xff]  }
  0x16   :  { %1547 = vmatprep.subr.bf16.mxu1 %v1732_v21  ;;  %v1789_v60 = vld [vmem:[%s2280_s1 + $0x168] sm:$0xff]   ;;  %v1798_v1 = vld [vmem:[%s2280_s1 + $0x130] sm:$0xff]   ;;  %v1785_v3 = vld [vmem:[%s2281_s0 + $0x124] ss:$28 sps:$4 sm:$0xff]  }
  0x17   :  { %v1790_v61 = vld [vmem:[%s2280_s1 + $0x128] sm:$0xff]   ;;  %v1805_v4 = vld [vmem:[%s2280_s1 + $0x178] sm:$0xff]   ;;  %v1813_v8 = vld [vmem:[%s2280_s1 + $0x180] sm:$0xff]  }
  0x18   :  { %1484 = vmatpush3.bf16.msra.mxu0 %v1733_v22  ;;  %v1780_v63 = vld [vmem:[%s2281_s0 + $0xe8] ss:$28 sps:$4 sm:$0xff]   ;;  %v1806_v5 = vld [vmem:[%s2280_s1 + $0x138] sm:$0xff]   ;;  %v1791_v9 = vld [vmem:[%s2281_s0 + $0x154] ss:$28 sps:$4 sm:$0xff]  }
  0x19   :  { %1548 = vmatpush3.bf16.msra.mxu1 %v1734_v23  ;;  %1485 = vmatprep.subr.bf16.mxu0 %v1735_v24  ;;  %v1787_v6 = vld [vmem:[%s2281_s0 + $0x118] ss:$28 sps:$4 sm:$0xff]   ;;  %v1788_v7 = vld [vmem:[%s2281_s0 + $0x120] ss:$28 sps:$4 sm:$0xff]   ;;  %v1795_v11 = vld [vmem:[%s2281_s0 + $0x150] ss:$28 sps:$4 sm:$0xff]  }
  0x1a   :  { %1549 = vmatprep.subr.bf16.mxu1 %v1736_v25  ;;  %v1793_v10 = vld [vmem:[%s2281_s0 + $0x15c] ss:$28 sps:$4 sm:$0xff]   ;;  %v1799_v13 = vld [vmem:[%s2281_s0 + $0x18c] ss:$28 sps:$4 sm:$0xff]   ;;  %v1801_v14 = vld [vmem:[%s2281_s0 + $0x194] ss:$28 sps:$4 sm:$0xff]  }
  0x1b   :  { %v1796_v12 = vld [vmem:[%s2281_s0 + $0x158] ss:$28 sps:$4 sm:$0xff]   ;;  %v1803_v15 = vld [vmem:[%s2281_s0 + $0x188] ss:$28 sps:$4 sm:$0xff]   ;;  %v1804_v16 = vld [vmem:[%s2281_s0 + $0x190] ss:$28 sps:$4 sm:$0xff]  }
  0x1c   :  { %1486 = vmatpush3.bf16.msra.mxu0 %v1737_v26  ;;  %v1809_v17 = vld [vmem:[%s2281_s0 + $0x14] ss:$28 sps:$4 sm:$0xff]   ;;  %v1812_v18 = vld [vmem:[%s2281_s0 + $0x164] ss:$28 sps:$4 sm:$0xff]   ;;  %v1814_v21 = vld [vmem:[%s2281_s0 + $0x4c] ss:$28 sps:$4 sm:$0xff]  }
  0x1d   :  { %1550 = vmatpush3.bf16.msra.mxu1 %v1738_v27  ;;  %1487 = vmatprep.subr.bf16.mxu0 %v1739_v28  ;;  %v1807_v19 = vld [vmem:[%s2281_s0 + $0x10] ss:$28 sps:$4 sm:$0xff]   ;;  %v1810_v20 = vld [vmem:[%s2281_s0 + $0x160] ss:$28 sps:$4 sm:$0xff]   ;;  %v1818_v24 = vld [vmem:[%s2281_s0 + $0x48] ss:$28 sps:$4 sm:$0xff]  }
  0x1e   :  { %1551 = vmatprep.subr.bf16.mxu1 %v1740_v29  ;;  %v1816_v22 = vld [vmem:[%s2281_s0 + $0x19c] ss:$28 sps:$4 sm:$0xff]   ;;  %v1820_v23 = vld [vmem:[%s2280_s1 + $0x188] sm:$0xff]   ;;  %v1821_v26 = vld [vmem:[%s2281_s0 + $0x84] ss:$28 sps:$4 sm:$0xff]  }
  0x1f   :  { %v1819_v25 = vld [vmem:[%s2281_s0 + $0x198] ss:$28 sps:$4 sm:$0xff]   ;;  %v1824_v28 = vld [vmem:[%s2281_s0 + $0x80] ss:$28 sps:$4 sm:$0xff]   ;;  %v1825_v29 = vld [vmem:[%s2281_s0 + $0x50] ss:$28 sps:$4 sm:$0xff]  }
  0x20   :  { %1488 = vmatpush3.bf16.msra.mxu0 %v1741_v30  ;;  %v1823_v27 = vld [vmem:[%s2281_s0 + $0x18] ss:$28 sps:$4 sm:$0xff]   ;;  %v1830_v33 = vld [vmem:[%s2281_s0 + $0xc0] ss:$28 sps:$4 sm:$0xff]  }
  0x21   :  { %1552 = vmatpush3.bf16.msra.mxu1 %v1742_v31  ;;  %1601 = vmatprep.subr.bf16.mxu0 %v1749_v36  ;;  %v1826_v30 = vld [vmem:[%s2281_s0 + $0xbc] ss:$28 sps:$4 sm:$0xff]   ;;  %v1828_v31 = vld [vmem:[%s2281_s0 + $0x88] ss:$28 sps:$4 sm:$0xff]  }
  0x22   :  { %1695 = vmatprep.subr.bf16.mxu1 %v1749_v36  ;;  %v1833_v35 = vld [vmem:[%s2281_s0 + $0xf8] ss:$28 sps:$4 sm:$0xff]   ;;  %v1834_v36 = vld [vmem:[%s2281_s0 + $0xf0] ss:$28 sps:$4 sm:$0xff]  }
  0x23   :  { %824 = vmatmul.mubr.bf16.vlgmr.msra.gmra.mrb[0].mxu0 %v1743_v32  ;;  %v1829_v32 = vld [vmem:[%s2281_s0 + $0xb8] ss:$28 sps:$4 sm:$0xff]  }
  0x24   :  { %921 = vmatmul.mubr.bf16.vlgmr.msra.gmra.mrb[0].mxu1 %v1746_v34  ;;  %1602 = vmatpush3.bf16.msra.mxu0 %v1750_v37  ;;  %v1831_v34 = vld [vmem:[%s2281_s0 + $0xf4] ss:$28 sps:$4 sm:$0xff]  }
  0x25   :  { %1703 = vmatpush3.bf16.msra.mxu1 %v1750_v37  ;;  %831 = vmatprep.mubr.bf16.mxu0 %v1751_v38  ;;  %v1835_v37 = vld [vmem:[%s2281_s0 + $0x130] ss:$28 sps:$4 sm:$0xff]  }
  0x26   :  { %928 = vmatprep.mubr.bf16.mxu1 %v1753_v39  ;;  %1603 = vmatprep.subr.bf16.mxu0 %v1757_v42  ;;  %v1836_v38 = vld [vmem:[%s2281_s0 + $0x12c] ss:$28 sps:$4 sm:$0xff]  }
  0x27   :  { %1696 = vmatprep.subr.bf16.mxu1 %v1757_v42  ;;  %v1838_v39 = vld [vmem:[%s2281_s0 + $0x168] ss:$28 sps:$4 sm:$0xff]  }
  0x28   :  { %1604 = vmatpush3.bf16.msra.mxu0 %v1758_v43 }
  0x29   :  { %1704 = vmatpush3.bf16.msra.mxu1 %v1758_v43  ;;  %1605 = vmatprep.subr.bf16.mxu0 %v1765_v46  ;;  %v2190_v43 = vld [vmem:[%s2282_s2] ss:$0 sm:$0xff] }
  0x2a   :  { %1697 = vmatprep.subr.bf16.mxu1 %v1765_v46 }
  0x2b   :  { %832 = vmatmul.mubr.bf16.gmra.mrb[4].mxu0 %v1755_v40  ;;  %v1839_v40 = vld [vmem:[%s2281_s0 + $0x128] ss:$28 sps:$4 sm:$0xff]  }
  0x2c   :  { %929 = vmatmul.mubr.bf16.gmra.mrb[4].mxu1 %v1756_v41  ;;  %839 = vmatprep.mubr.bf16.mxu0 %v1759_v44  ;;  %v1840_v41 = vld [vmem:[%s2281_s0 + $0x1a0] ss:$28 sps:$4 sm:$0xff]  }
  0x2d   :  { %936 = vmatprep.mubr.bf16.mxu1 %v1761_v45  ;;  %1606 = vmatpush3.bf16.msra.mxu0 %v1766_v47 }
  0x2e   :  { %1705 = vmatpush3.bf16.msra.mxu1 %v1766_v47  ;;  %1607 = vmatprep.subr.bf16.mxu0 %v1773_v52 }
  0x2f   :  { %1698 = vmatprep.subr.bf16.mxu1 %v1773_v52 }
  0x31   :  { %1608 = vmatpush3.bf16.msra.mxu0 %v1774_v53 }
  0x32   :  { %1706 = vmatpush3.bf16.msra.mxu1 %v1774_v53  ;;  %1609 = vmatprep.subr.bf16.mxu0 %v1781_v54 }
  0x33   :  { %840 = vmatmul.mubr.bf16.gmra.mrb[8].mxu0 %v1763_v48  ;;  %1699 = vmatprep.subr.bf16.mxu1 %v1781_v54 }
  0x34   :  { %937 = vmatmul.mubr.bf16.gmra.mrb[8].mxu1 %v1764_v49  ;;  %847 = vmatprep.mubr.bf16.mxu0 %v1767_v50 }
  0x35   :  { %944 = vmatprep.mubr.bf16.mxu1 %v1769_v51  ;;  %1610 = vmatpush3.bf16.msra.mxu0 %v1782_v55 }
  0x36   :  { %1707 = vmatpush3.bf16.msra.mxu1 %v1782_v55  ;;  %1611 = vmatprep.subr.bf16.mxu0 %v1789_v60 }
  0x37   :  { %1700 = vmatprep.subr.bf16.mxu1 %v1789_v60 }
  0x39   :  { %1612 = vmatpush3.bf16.msra.mxu0 %v1790_v61 }
  0x3a   :  { %1708 = vmatpush3.bf16.msra.mxu1 %v1790_v61  ;;  %1613 = vmatprep.subr.bf16.mxu0 %v1797_v0 }
  0x3b   :  { %848 = vmatmul.mubr.bf16.gmra.mrb[12].mxu0 %v1771_v56  ;;  %1701 = vmatprep.subr.bf16.mxu1 %v1797_v0 }
  0x3c   :  { %945 = vmatmul.mubr.bf16.gmra.mrb[12].mxu1 %v1772_v57  ;;  %855 = vmatprep.mubr.bf16.mxu0 %v1775_v58 }
  0x3d   :  { %952 = vmatprep.mubr.bf16.mxu1 %v1777_v59  ;;  %1614 = vmatpush3.bf16.msra.mxu0 %v1798_v1 }
  0x3e   :  { %1709 = vmatpush3.bf16.msra.mxu1 %v1798_v1  ;;  %1615 = vmatprep.subr.bf16.mxu0 %v1805_v4 }
  0x3f   :  { %1702 = vmatprep.subr.bf16.mxu1 %v1805_v4 }
  0x41   :  { %1616 = vmatpush3.bf16.msra.mxu0 %v1806_v5 }
  0x42   :  { %1710 = vmatpush3.bf16.msra.mxu1 %v1806_v5 }
  0x43   :  { %856 = vmatmul.mubr.bf16.gmra.mrb[16].mxu0 %v1779_v62  ;;  %1675 = vmatprep.subr.bf16.mxu1 %v1813_v8 }
  0x44   :  { %953 = vmatmul.mubr.bf16.gmra.mrb[16].mxu1 %v1780_v63  ;;  %863 = vmatprep.mubr.bf16.mxu0 %v1783_v2 }
  0x45   :  { %960 = vmatprep.mubr.bf16.mxu1 %v1785_v3 }
  0x4b   :  { %864 = vmatmul.mubr.bf16.gmra.mrb[20].mxu0 %v1787_v6 }
  0x4c   :  { %961 = vmatmul.mubr.bf16.gmra.mrb[20].mxu1 %v1788_v7  ;;  %871 = vmatprep.mubr.bf16.mxu0 %v1791_v9 }
  0x4d   :  { %968 = vmatprep.mubr.bf16.mxu1 %v1793_v10 }
  0x53   :  { %872 = vmatmul.mubr.bf16.gmra.mrb[24].mxu0 %v1795_v11 }
  0x54   :  { %969 = vmatmul.mubr.bf16.gmra.mrb[24].mxu1 %v1796_v12  ;;  %879 = vmatprep.mubr.bf16.mxu0 %v1799_v13 }
  0x55   :  { %976 = vmatprep.mubr.bf16.mxu1 %v1801_v14 }
  0x5b   :  { %880 = vmatmul.mubr.bf16.gmra.mrb[28].mxu0 %v1803_v15 }
  0x5c   :  { %977 = vmatmul.mubr.bf16.gmra.mrb[28].mxu1 %v1804_v16  ;;  %1017 = vmatprep.mubr.bf16.mxu0 %v1809_v17 }
  0x5d   :  { %1065 = vmatprep.mubr.bf16.mxu1 %v1812_v18 }
  0x63   :  { %1018 = vmatmul.mubr.bf16.vlgmr.msra.gmra.mrb[32].mxu0 %v1807_v19 }
  0x64   :  { %1066 = vmatmul.mubr.bf16.vlgmr.msra.gmra.mrb[32].mxu1 %v1810_v20  ;;  %1025 = vmatprep.mubr.bf16.mxu0 %v1814_v21 }
  0x65   :  { %1676 = vmatpush3.bf16.msra.mxu1 %v1813_v8  ;;  %1073 = vmatprep.mubr.bf16.mxu1 %v1816_v22 }
  0x66   :  { %1677 = vmatprep.subr.bf16.mxu1 %v1820_v23 }
  0x69   :  { %1678 = vmatpush3.bf16.msra.mxu1 %v1820_v23 }
  0x6b   :  { %1026 = vmatmul.mubr.bf16.gmra.mrb[36].mxu0 %v1818_v24 }
  0x6c   :  { %1074 = vmatmul.mubr.bf16.gmra.mrb[36].mxu1 %v1819_v25  ;;  %1033 = vmatprep.mubr.bf16.mxu0 %v1821_v26 }
  0x6d   :  { %1679 = vmatprep.mubr.msk.bf16.mxu1 %vm766_vm0, %v1823_v27 }
  0x73   :  { %1034 = vmatmul.mubr.bf16.gmra.mrb[40].mxu0 %v1824_v28 }
  0x74   :  { %1680 = vmatmul.mubr.msk.bf16.vlgmr.msra.gmra.mrb[40].mxu1 %vm766_vm0, %v1825_v29  ;;  %1041 = vmatprep.mubr.bf16.mxu0 %v1826_v30 }
  0x75   :  { %1683 = vmatprep.mubr.msk.bf16.mxu1 %vm766_vm0, %v1828_v31 }
  0x7b   :  { %1042 = vmatmul.mubr.bf16.gmra.mrb[44].mxu0 %v1829_v32 }
  0x7c   :  { %1684 = vmatmul.mubr.msk.bf16.gmra.mrb[44].mxu1 %vm766_vm0, %v1830_v33  ;;  %1049 = vmatprep.mubr.bf16.mxu0 %v1831_v34 }
  0x7d   :  { %1687 = vmatprep.mubr.msk.bf16.mxu1 %vm766_vm0, %v1833_v35 }
  0x83   :  { %1050 = vmatmul.mubr.bf16.gmra.mrb[48].mxu0 %v1834_v36 }
  0x84   :  { %1688 = vmatmul.mubr.msk.bf16.gmra.mrb[48].mxu1 %vm766_vm0, %v1835_v37  ;;  %1057 = vmatprep.mubr.bf16.mxu0 %v1836_v38 }
  0x85   :  { %1691 = vmatprep.mubr.msk.bf16.mxu1 %vm766_vm0, %v1838_v39 }
  0x8b   :  { %1058 = vmatmul.mubr.bf16.gmra.mrb[52].mxu0 %v1839_v40 }
  0x8c   :  { %1692 = vmatmul.mubr.msk.bf16.gmra.mrb[52].mxu1 %vm766_vm0, %v1840_v41 }
  0xf6   :  { %v1489_v42 = vpop.f32.mrb[0].mxu0 }
  0xf7   :  { %v1490_v44 = vpop.f32.mrb[1].mxu0  ;;  %v1553_v45 = vpop.f32.mrb[0].mxu1 }
  0xf8   :  { %v1491_v46 = vadd.f32 %v1490_v44, %v1489_v42  ;;  %v1492_v47 = vpop.f32.mrb[2].mxu0  ;;  %v1554_v48 = vpop.f32.mrb[1].mxu1 }
  0xf9   :  { %v1493_v49 = vpop.f32.mrb[3].mxu0  ;;  %v1555_v50 = vadd.f32 %v1554_v48, %v1553_v45  ;;  %v1556_v51 = vpop.f32.mrb[2].mxu1 }
  0xfa   :  { %v826_v52 = vadd.f32 %v1491_v46, %v2190_v43  ;;  %v1494_v53 = vadd.f32 %v1493_v49, %v1492_v47  ;;  %v1557_v54 = vpop.f32.mrb[3].mxu1 }
  0xfb   :  { %v1558_v55 = vadd.f32 %v1557_v54, %v1556_v51 }
  0xfc   :  { %v829_v56 = vadd.f32 %v1494_v53, %v2190_v43  ;;  %v2194_v57 = vadd.f32 %v1555_v50, %v826_v52 }
  0xfe   :  { %v2196_v58 = vadd.f32 %v1558_v55, %v829_v56  ;;  %v1495_v59 = vpop.f32.mrb[4].mxu0 }
  0xff   :  { %v1496_v60 = vpop.f32.mrb[5].mxu0  ;;  %v1559_v61 = vpop.f32.mrb[4].mxu1 }
 0x100   :  { %v1497_v62 = vadd.f32 %v1496_v60, %v1495_v59  ;;  %v1498_v63 = vpop.f32.mrb[6].mxu0  ;;  %v1560_v0 = vpop.f32.mrb[5].mxu1 }
 0x101   :  { %v1499_v1 = vpop.f32.mrb[7].mxu0  ;;  %v1561_v2 = vadd.f32 %v1560_v0, %v1559_v61  ;;  %v1562_v3 = vpop.f32.mrb[6].mxu1 }
 0x102   :  { %v834_v4 = vadd.f32 %v1497_v62, %v2190_v43  ;;  %v1500_v5 = vadd.f32 %v1499_v1, %v1498_v63  ;;  %v1563_v6 = vpop.f32.mrb[7].mxu1 }
 0x103   :  { %v1564_v7 = vadd.f32 %v1563_v6, %v1562_v3 }
 0x104   :  { %v837_v8 = vadd.f32 %v1500_v5, %v2190_v43  ;;  %v2200_v9 = vadd.f32 %v1561_v2, %v834_v4 }
 0x106   :  { %v2202_v10 = vadd.f32 %v1564_v7, %v837_v8  ;;  %v1501_v11 = vpop.f32.mrb[8].mxu0 }
 0x107   :  { %v1502_v12 = vpop.f32.mrb[9].mxu0  ;;  %v1565_v13 = vpop.f32.mrb[8].mxu1 }
 0x108   :  { %v1503_v14 = vadd.f32 %v1502_v12, %v1501_v11  ;;  %v1504_v15 = vpop.f32.mrb[10].mxu0  ;;  %v1566_v16 = vpop.f32.mrb[9].mxu1 }
 0x109   :  { %v1505_v17 = vpop.f32.mrb[11].mxu0  ;;  %v1567_v18 = vadd.f32 %v1566_v16, %v1565_v13  ;;  %v1568_v19 = vpop.f32.mrb[10].mxu1 }
 0x10a   :  { %v842_v20 = vadd.f32 %v1503_v14, %v2190_v43  ;;  %v1506_v21 = vadd.f32 %v1505_v17, %v1504_v15  ;;  %v1569_v22 = vpop.f32.mrb[11].mxu1 }
 0x10b   :  { %v1570_v23 = vadd.f32 %v1569_v22, %v1568_v19 }
 0x10c   :  { %v845_v24 = vadd.f32 %v1506_v21, %v2190_v43  ;;  %v2206_v25 = vadd.f32 %v1567_v18, %v842_v20 }
 0x10e   :  { %v2208_v26 = vadd.f32 %v1570_v23, %v845_v24  ;;  %v1507_v27 = vpop.f32.mrb[12].mxu0 }
 0x10f   :  { %v1508_v28 = vpop.f32.mrb[13].mxu0  ;;  %v1571_v29 = vpop.f32.mrb[12].mxu1 }
 0x110   :  { %v1509_v30 = vadd.f32 %v1508_v28, %v1507_v27  ;;  %v1510_v31 = vpop.f32.mrb[14].mxu0  ;;  %v1572_v32 = vpop.f32.mrb[13].mxu1 }
 0x111   :  { %v1511_v33 = vpop.f32.mrb[15].mxu0  ;;  %v1573_v34 = vadd.f32 %v1572_v32, %v1571_v29  ;;  %v1574_v35 = vpop.f32.mrb[14].mxu1 }
 0x112   :  { %v850_v36 = vadd.f32 %v1509_v30, %v2190_v43  ;;  %v1512_v37 = vadd.f32 %v1511_v33, %v1510_v31  ;;  %v1575_v38 = vpop.f32.mrb[15].mxu1 }
 0x113   :  { %v1576_v39 = vadd.f32 %v1575_v38, %v1574_v35 }
 0x114   :  { %v853_v40 = vadd.f32 %v1512_v37, %v2190_v43  ;;  %v2212_v41 = vadd.f32 %v1573_v34, %v850_v36 }
 0x116   :  { %v2214_v42 = vadd.f32 %v1576_v39, %v853_v40  ;;  %v1513_v44 = vpop.f32.mrb[16].mxu0 }
 0x117   :  { %v1514_v45 = vpop.f32.mrb[17].mxu0  ;;  %v1577_v46 = vpop.f32.mrb[16].mxu1 }
 0x118   :  { %v1515_v47 = vadd.f32 %v1514_v45, %v1513_v44  ;;  %v1516_v48 = vpop.f32.mrb[18].mxu0  ;;  %v1578_v49 = vpop.f32.mrb[17].mxu1 }
 0x119   :  { %v1517_v50 = vpop.f32.mrb[19].mxu0  ;;  %v1579_v51 = vadd.f32 %v1578_v49, %v1577_v46  ;;  %v1580_v52 = vpop.f32.mrb[18].mxu1 }
 0x11a   :  { %v858_v53 = vadd.f32 %v1515_v47, %v2190_v43  ;;  %v1518_v54 = vadd.f32 %v1517_v50, %v1516_v48  ;;  %v1581_v55 = vpop.f32.mrb[19].mxu1 }
 0x11b   :  { %v1582_v56 = vadd.f32 %v1581_v55, %v1580_v52 }
 0x11c   :  { %v861_v59 = vadd.f32 %v1518_v54, %v2190_v43  ;;  %v2218_v60 = vadd.f32 %v1579_v51, %v858_v53 }
 0x11e   :  { %v2220_v61 = vadd.f32 %v1582_v56, %v861_v59  ;;  %v1519_v62 = vpop.f32.mrb[20].mxu0 }
 0x11f   :  { %v1520_v63 = vpop.f32.mrb[21].mxu0  ;;  %v1583_v0 = vpop.f32.mrb[20].mxu1 }
 0x120   :  { %v1521_v1 = vadd.f32 %v1520_v63, %v1519_v62  ;;  %v1522_v2 = vpop.f32.mrb[22].mxu0  ;;  %v1584_v3 = vpop.f32.mrb[21].mxu1 }
 0x121   :  { %v1523_v4 = vpop.f32.mrb[23].mxu0  ;;  %v1585_v5 = vadd.f32 %v1584_v3, %v1583_v0  ;;  %v1586_v6 = vpop.f32.mrb[22].mxu1 }
 0x122   :  { %v866_v7 = vadd.f32 %v1521_v1, %v2190_v43  ;;  %v1524_v8 = vadd.f32 %v1523_v4, %v1522_v2  ;;  %v1587_v11 = vpop.f32.mrb[23].mxu1 }
 0x123   :  { %v1588_v12 = vadd.f32 %v1587_v11, %v1586_v6 }
 0x124   :  { %v869_v13 = vadd.f32 %v1524_v8, %v2190_v43  ;;  %v2224_v14 = vadd.f32 %v1585_v5, %v866_v7 }
 0x126   :  { %v2226_v15 = vadd.f32 %v1588_v12, %v869_v13  ;;  %v1525_v16 = vpop.f32.mrb[24].mxu0 }
 0x127   :  { %v1526_v17 = vpop.f32.mrb[25].mxu0  ;;  %v1589_v18 = vpop.f32.mrb[24].mxu1 }
 0x128   :  { %v1527_v19 = vadd.f32 %v1526_v17, %v1525_v16  ;;  %v1528_v20 = vpop.f32.mrb[26].mxu0  ;;  %v1590_v21 = vpop.f32.mrb[25].mxu1 }
 0x129   :  { %v1529_v22 = vpop.f32.mrb[27].mxu0  ;;  %v1591_v23 = vadd.f32 %v1590_v21, %v1589_v18  ;;  %v1592_v24 = vpop.f32.mrb[26].mxu1 }
 0x12a   :  { %v874_v27 = vadd.f32 %v1527_v19, %v2190_v43  ;;  %v1530_v28 = vadd.f32 %v1529_v22, %v1528_v20  ;;  %v1593_v29 = vpop.f32.mrb[27].mxu1 }
 0x12b   :  { %v1594_v30 = vadd.f32 %v1593_v29, %v1592_v24 }
 0x12c   :  { %v877_v31 = vadd.f32 %v1530_v28, %v2190_v43  ;;  %v971_v32 = vadd.f32 %v1591_v23, %v874_v27 }
 0x12e   :  { %v974_v33 = vadd.f32 %v1594_v30, %v877_v31  ;;  %v1531_v34 = vpop.f32.mrb[28].mxu0 }
 0x12f   :  { %v1532_v35 = vpop.f32.mrb[29].mxu0  ;;  %v1595_v36 = vpop.f32.mrb[28].mxu1 }
 0x130   :  { %v1533_v37 = vadd.f32 %v1532_v35, %v1531_v34  ;;  %v1534_v38 = vpop.f32.mrb[30].mxu0  ;;  %v1596_v39 = vpop.f32.mrb[29].mxu1 }
 0x131   :  { %v1535_v40 = vpop.f32.mrb[31].mxu0  ;;  %v1597_v44 = vadd.f32 %v1596_v39, %v1595_v36  ;;  %v1598_v45 = vpop.f32.mrb[30].mxu1 }
 0x132   :  { %v882_v46 = vadd.f32 %v1533_v37, %v2190_v43  ;;  %v1536_v47 = vadd.f32 %v1535_v40, %v1534_v38  ;;  %v1599_v48 = vpop.f32.mrb[31].mxu1 }
 0x133   :  { %v1600_v49 = vadd.f32 %v1599_v48, %v1598_v45 }
 0x134   :  { %v885_v50 = vadd.f32 %v1536_v47, %v2190_v43  ;;  %v979_v51 = vadd.f32 %v1597_v44, %v882_v46 }
 0x136   :  { %v982_v52 = vadd.f32 %v1600_v49, %v885_v50  ;;  %v1617_v53 = vpop.f32.mrb[32].mxu0 }
 0x137   :  { %v1653_v54 = vpop.f32.mrb[32].mxu1  ;;  %v1618_v55 = vpop.f32.mrb[33].mxu0 }
 0x138   :  { %v1619_v56 = vadd.f32 %v1618_v55, %v1617_v53  ;;  %v1654_v59 = vpop.f32.mrb[33].mxu1  ;;  %v1620_v62 = vpop.f32.mrb[34].mxu0 }
 0x139   :  { %v1655_v63 = vadd.f32 %v1654_v59, %v1653_v54  ;;  %v1656_v0 = vpop.f32.mrb[34].mxu1  ;;  %v1621_v1 = vpop.f32.mrb[35].mxu0 }
 0x13a   :  { %v1622_v2 = vadd.f32 %v1621_v1, %v1620_v62  ;;  %v1657_v3 = vpop.f32.mrb[35].mxu1  ;;  %v1020_v4 = vadd.f32 %v1619_v56, %v2194_v57 }
 0x13b   :  { %v1658_v5 = vadd.f32 %v1657_v3, %v1656_v0  ;;  %v2233_v6 = vadd.f32 %v1655_v63, %v971_v32 }
 0x13c   :  { %v1023_v43 = vadd.f32 %v1622_v2, %v2196_v58 }
 0x13d   :  { %v2236_v7 = vadd.f32 %v1658_v5, %v974_v33 }
 0x13e   :  { %v1623_v8 = vpop.f32.mrb[36].mxu0 }
 0x13f   :  { %v1659_v11 = vpop.f32.mrb[36].mxu1  ;;  %v1624_v12 = vpop.f32.mrb[37].mxu0 }
 0x140   :  { %v1625_v13 = vadd.f32 %v1624_v12, %v1623_v8  ;;  %v1660_v16 = vpop.f32.mrb[37].mxu1  ;;  %v1626_v17 = vpop.f32.mrb[38].mxu0 }
 0x141   :  { %v1661_v18 = vadd.f32 %v1660_v16, %v1659_v11  ;;  %v1662_v19 = vpop.f32.mrb[38].mxu1  ;;  %v1627_v20 = vpop.f32.mrb[39].mxu0 }
 0x142   :  { %v1628_v21 = vadd.f32 %v1627_v20, %v1626_v17  ;;  %v1663_v22 = vpop.f32.mrb[39].mxu1  ;;  %v1028_v57 = vadd.f32 %v1625_v13, %v2200_v9 }
 0x143   :  { %v1664_v23 = vadd.f32 %v1663_v22, %v1662_v19  ;;  %v2239_v24 = vadd.f32 %v1661_v18, %v979_v51 }
 0x144   :  { %v1031_v58 = vadd.f32 %v1628_v21, %v2202_v10 }
 0x145   :  { %v2242_v27 = vadd.f32 %v1664_v23, %v982_v52 }
 0x146   :  { %v1629_v28 = vpop.f32.mrb[40].mxu0 }
 0x147   :  { %v1681_v29 = vpop.f32.mrb[40].mxu1  ;;  %v1630_v30 = vpop.f32.mrb[41].mxu0 }
 0x148   :  { %v1125_v31 = vadd.f32 %v1681_v29, %v1028_v57  ;;  %v1631_v32 = vadd.f32 %v1630_v30, %v1629_v28  ;;  %v1116_v33 = vpop.f32.mrb[41].mxu1  ;;  %v1632_v34 = vpop.f32.mrb[42].mxu0 }
 0x149   :  { %v1117_v35 = vadd.f32 %v1116_v33, %v1020_v4  ;;  %v1682_v36 = vpop.f32.mrb[42].mxu1  ;;  %v1633_v37 = vpop.f32.mrb[43].mxu0 }
 0x14a   :  { %v1128_v38 = vadd.f32 %v1682_v36, %v1031_v58  ;;  %v1634_v39 = vadd.f32 %v1633_v37, %v1632_v34  ;;  %v1119_v9 = vpop.f32.mrb[43].mxu1  ;;  %v1036_v40 = vadd.f32 %v1631_v32, %v2206_v25  ;;  %v1181_v45 = vmax.f32 %v1125_v31, 0.0 }
 0x14b   :  { %v1120_v44 = vadd.f32 %v1119_v9, %v1023_v43  ;;  %v1179_v47 = vmax.f32 %v1117_v35, 0.0 }
 0x14c   :  { %v1182_v10 = vmax.f32 %v1128_v38, 0.0  ;;  %v1039_v46 = vadd.f32 %v1634_v39, %v2208_v26 }
 0x14d   :  { %v1180_v48 = vmax.f32 %v1120_v44, 0.0 }
 0x14e   :  { %v1434_v49 = vpack.c.bf16 %v1182_v10, %v1181_v45  ;;  %v1635_v50 = vpop.f32.mrb[44].mxu0 }
 0x14f   :  { %v1429_v51 = vpack.c.bf16 %v1180_v48, %v1179_v47  ;;  %v1685_v52 = vpop.f32.mrb[44].mxu1  ;;  %v1636_v53 = vpop.f32.mrb[45].mxu0 }
 0x150   :  { %1466 = vst [vmem:[%s2283_s3 + $0x8] sm:$0xff] %v1434_v49   ;;  %v1637_v54 = vadd.f32 %v1636_v53, %v1635_v50  ;;  %v1132_v55 = vpop.f32.mrb[45].mxu1  ;;  %v1638_v56 = vpop.f32.mrb[46].mxu0 }
 0x151   :  { %1430 = vst [vmem:[%s2283_s3] sm:$0xff] %v1429_v51   ;;  %v1133_v25 = vadd.f32 %v1132_v55, %v1036_v40  ;;  %v1686_v26 = vpop.f32.mrb[46].mxu1  ;;  %v1639_v59 = vpop.f32.mrb[47].mxu0 }
 0x152   :  { %v1044_v62 = vadd.f32 %v1637_v54, %v2212_v41  ;;  %v1640_v63 = vadd.f32 %v1639_v59, %v1638_v56  ;;  %v1135_v0 = vpop.f32.mrb[47].mxu1 }
 0x153   :  { %v1136_v1 = vadd.f32 %v1135_v0, %v1039_v46  ;;  %v1183_v4 = vmax.f32 %v1133_v25, 0.0 }
 0x154   :  { %v1141_v2 = vadd.f32 %v1685_v52, %v1044_v62  ;;  %v1047_v3 = vadd.f32 %v1640_v63, %v2214_v42 }
 0x155   :  { %v1184_v5 = vmax.f32 %v1136_v1, 0.0 }
 0x156   :  { %v1144_v43 = vadd.f32 %v1686_v26, %v1047_v3  ;;  %v1641_v8 = vpop.f32.mrb[48].mxu0  ;;  %v1185_v16 = vmax.f32 %v1141_v2, 0.0 }
 0x157   :  { %v1439_v11 = vpack.c.bf16 %v1184_v5, %v1183_v4  ;;  %v1642_v12 = vpop.f32.mrb[49].mxu0  ;;  %v1689_v13 = vpop.f32.mrb[48].mxu1 }
 0x158   :  { %v1186_v17 = vmax.f32 %v1144_v43, 0.0  ;;  %v1643_v18 = vadd.f32 %v1642_v12, %v1641_v8  ;;  %v1644_v19 = vpop.f32.mrb[50].mxu0  ;;  %v1148_v20 = vpop.f32.mrb[49].mxu1 }
 0x159   :  { %1467 = vst [vmem:[%s2283_s3 + $0x10] sm:$0xff] %v1439_v11   ;;  %v1645_v41 = vpop.f32.mrb[51].mxu0  ;;  %v1690_v21 = vpop.f32.mrb[50].mxu1 }
 0x15a   :  { %v1444_v22 = vpack.c.bf16 %v1186_v17, %v1185_v16  ;;  %v1646_v42 = vadd.f32 %v1645_v41, %v1644_v19  ;;  %v1052_v57 = vadd.f32 %v1643_v18, %v2218_v60  ;;  %v1151_v23 = vpop.f32.mrb[51].mxu1 }
 0x15c   :  { %1468 = vst [vmem:[%s2283_s3 + $0x18] sm:$0xff] %v1444_v22   ;;  %v1149_v58 = vadd.f32 %v1148_v20, %v1052_v57  ;;  %v1055_v28 = vadd.f32 %v1646_v42, %v2220_v61 }
 0x15e   :  { %v1152_v29 = vadd.f32 %v1151_v23, %v1055_v28  ;;  %v1647_v30 = vpop.f32.mrb[52].mxu0  ;;  %v1187_v33 = vmax.f32 %v1149_v58, 0.0 }
 0x15f   :  { %v1693_v31 = vpop.f32.mrb[52].mxu1  ;;  %v1648_v32 = vpop.f32.mrb[53].mxu0 }
 0x160   :  { %v1188_v34 = vmax.f32 %v1152_v29, 0.0  ;;  %v1173_v35 = vadd.f32 %v1693_v31, %v2239_v24  ;;  %v1649_v36 = vadd.f32 %v1648_v32, %v1647_v30  ;;  %v1164_v37 = vpop.f32.mrb[53].mxu1  ;;  %v1650_v38 = vpop.f32.mrb[54].mxu0 }
 0x161   :  { %v1165_v60 = vadd.f32 %v1164_v37, %v2233_v6  ;;  %v1694_v39 = vpop.f32.mrb[54].mxu1  ;;  %v1651_v9 = vpop.f32.mrb[55].mxu0 }
 0x162   :  { %v1449_v40 = vpack.c.bf16 %v1188_v34, %v1187_v33  ;;  %v1060_v44 = vadd.f32 %v1649_v36, %v2224_v14  ;;  %v1176_v61 = vadd.f32 %v1694_v39, %v2242_v27  ;;  %v1167_v45 = vpop.f32.mrb[55].mxu1  ;;  %v1652_v10 = vadd.f32 %v1651_v9, %v1650_v38 }
 0x163   :  { %v1168_v46 = vadd.f32 %v1167_v45, %v2236_v7  ;;  %v1193_v24 = vmax.f32 %v1173_v35, 0.0  ;;  %v1191_v49 = vmax.f32 %v1165_v60, 0.0 }
 0x164   :  { %1469 = vst [vmem:[%s2283_s3 + $0x20] sm:$0xff] %v1449_v40   ;;  %v1157_v47 = vadd.f32 %v1689_v13, %v1060_v44  ;;  %v1194_v48 = vmax.f32 %v1176_v61, 0.0  ;;  %v1063_v6 = vadd.f32 %v1652_v10, %v2226_v15 }
 0x165   :  { %v1192_v50 = vmax.f32 %v1168_v46, 0.0 }
 0x166   :  { %v1464_v51 = vpack.c.bf16 %v1194_v48, %v1193_v24  ;;  %v1160_v52 = vadd.f32 %v1690_v21, %v1063_v6  ;;  %v1189_v27 = vmax.f32 %v1157_v47, 0.0 }
 0x167   :  { %v1459_v14 = vpack.c.bf16 %v1192_v50, %v1191_v49 }
 0x168   :  { %1472 = vst [vmem:[%s2283_s3 + $0x38] sm:$0xff] %v1464_v51   ;;  %v1190_v7 = vmax.f32 %v1160_v52, 0.0 }
 0x169   :  { %1471 = vst [vmem:[%s2283_s3 + $0x30] sm:$0xff] %v1459_v14  }
 0x16a   :  { %v1454_v53 = vpack.c.bf16 %v1190_v7, %v1189_v27 }
 0x16c   :  { %1470 = vst [vmem:[%s2283_s3 + $0x28] sm:$0xff] %v1454_v53  }

// kernel: view_transform_get_cam_feats.5
= control target key start
LH: loop header
LB: loop body
LE: loop exit
PB: predicated region body
PF: predicated region fallthrough
CT: control target
= control target key end

     0   :  { %s1842_s0 = inlined_call_operand.vmem [shape: bf16[2,64,128], index: 0, kind: input, shape index: {}]   ;;  %s1843_s1 = inlined_call_operand.vmem [shape: bf16[2,64,16], index: 1, kind: input, shape index: {}]   ;;  %s1844_s2 = inlined_call_operand.vmem [shape: bf16[128,144], index: 2, kind: input, shape index: {}]   ;;  %s1845_s3 = inlined_call_operand.vmem [shape: bf16[16,144], index: 3, kind: input, shape index: {}]   ;;  %s1846_s4 = inlined_call_operand.vmem [shape: f32[1,144], index: 4, kind: input, shape index: {}]   ;;  %s1847_s5 = inlined_call_operand.hbm [shape: bf16[2,8,64,16], index: 5, kind: output, shape index: {}]  }
   0x1   :  { %1848 = sst [smem:[#allocation7_spill]] %s1845_s3 }
   0x2   :  { %10 = vsyncpa [#allocation3], 0 }
   0x3   :  { %12 = vsyncpa [#allocation3 + $0x1], 0  ;;  %s1514_s18 = smov 0   ;;  %s1516_s19 = smov 0  }
   0x4   :  { %s1518_s20 = smov 0   ;;  %s1520_s21 = smov 0  }
   0x5   :  { %s1522_s22 = smov 0   ;;  %s1524_s23 = smov 0  }
   0x6   :  { %s1526_s24 = smov 0   ;;  %s1528_s25 = smov 0  }
   0x7 LB: > { %s1075_s26 = sadd.s32 4294967295, %s1468_s25   ;;  %s1076_s27 = sadd.s32 4294967294, %s1468_s25   ;;  %s1468_s25 = sphi %s1528_s25, %s18_s25   ;;  %s1464_s24 = sphi %s1526_s24, %s1858_s24   ;;  %s1460_s23 = sphi %s1524_s23, %s1857_s23   ;;  %s1456_s22 = sphi %s1522_s22, %s1856_s22   ;;  %s1452_s21 = sphi %s1520_s21, %s1855_s21   ;;  %s1448_s20 = sphi %s1518_s20, %s1854_s20   ;;  %s1444_s19 = sphi %s1516_s19, %s1853_s19   ;;  %s1440_s18 = sphi %s1514_s18, %s1852_s18  }
   0x8   : > { %s27_s28 = sadd.s32 1, %s1460_s23  ;;  %s30_s29 = sadd.s32 1, %s1464_s24 }
   0x9   : > { %p28_p0 = scmp.ge.s32.totalorder %s27_s28, 2  ;;  %p168_p1 = scmp.ne.s32.totalorder %s1448_s20, %s1444_s19 }
   0xa   : > { %p169_p2 = scmp.eq.s32.totalorder %s1075_s26, 3  ;;  %p174_p5 = scmp.ne.s32.totalorder %s1444_s19, %s1440_s18 }
   0xb   : > { %s1860_s28 = smov (%p28_p0, %s27_s28), 0  ;;  %s1862_s29 = smov (!%p28_p0, %s30_s29), %s1464_s24 }
   0xc   : > { %s154_s30 = ssub.s32 %s1460_s23, %s1860_s28  ;;  %p1565_p3 = por %p169_p2, %p168_p1 }
   0xd   : > { %p32_p4 = scmp.ge.s32.totalorder %s1862_s29, 2  ;;  %p175_p6 = scmp.eq.s32.totalorder %s1076_s27, 3 }
   0xe   : > { %p1079_p7 = scmp.ge.s32.totalorder %s1468_s25, 1  ;;  %p228_p9 = scmp.lt.s32.totalorder %s1468_s25, 5 }
   0xf   : > { %s1864_s29 = smov (%p32_p4, %s1862_s29), 0  ;;  %p1574_p8 = por %p175_p6, %p174_p5 }
  0x10   : > { %s153_s8 = ssub.s32 %s1464_s24, %s1864_s29  ;;  %s158_s9 = sadd.s32 1, %s1448_s20 }
  0x11   : > { %s155_s10 = sor.u32 %s154_s30, %s153_s8  ;;  %p229_p10 = pnand %p1079_p7, %p228_p9 }
  0x12   : > { %p156_p11 = scmp.eq.s32.totalorder %s155_s10, 0  ;;  %v1355_v0 = vld [vmem:[%s1844_s2 + $0x4] ss:$8 sps:$4 sm:$0xff] (!%p229_p10)   ;;  %s1589_s14 = sshll.u32 (!%p229_p10), %s1452_s21, 2  ;;  %v1357_v1 = vld [vmem:[%s1844_s2] ss:$8 sps:$4 sm:$0xff] (!%p229_p10)   ;;  %v544_v23 = vlaneseq (!%p229_p10) }
  0x13   : > { %232 = sbr.rel (%p229_p10) target bundleno = 829 (0x33d), region = 40  ;;  %v1470_v2 = vmov (!%p229_p10), 0   ;;  %p270_p12 = scmp.lt.s32.totalorder (!%p229_p10), %s1456_s22, 1  ;;  %1209 = vmatprep.subr.bf16.mxu1 (!%p229_p10), %v1355_v0  ;;  %v1361_v5 = vld [vmem:[%s1844_s2 + $0x14] ss:$8 sps:$4 sm:$0xff] (!%p229_p10)   ;;  %vm337_vm0 = vcmask (!%p229_p10), 130048  }
  0x14   : > { %s1583_s11 = scalar_select %p156_p11, %s1448_s20, %s158_s9  }
  0x15   : > { %376 = vmatprep.mubr.bf16.mxu0 (!%p229_p10), %v1470_v2  ;;  %p272_p13 = scmp.lt.s32.totalorder (!%p229_p10), %s1589_s14, 7  ;;  %531 = vmatprep.mubr.bf16.mxu1 (!%p229_p10), %v1470_v2  ;;  %s1851_s3 = sld [smem:[#allocation7_spill]] (!%p229_p10)  ;;  %v1363_v6 = vld [vmem:[%s1844_s2 + $0x10] ss:$8 sps:$4 sm:$0xff] (!%p229_p10)   ;;  %v1365_v7 = vld [vmem:[%s1844_s2 + $0x24] ss:$8 sps:$4 sm:$0xff] (!%p229_p10)  }
  0x16   : > { %1324 = vset.pattern.permute.xlu1 (!%p229_p10), %v1470_v2  ;;  %1217 = vmatpush1.bf16.msra.mxu1 (!%p229_p10), %v1357_v1  ;;  %v1367_v8 = vld [vmem:[%s1844_s2 + $0x20] ss:$8 sps:$4 sm:$0xff] (!%p229_p10)   ;;  %v1368_v9 = vld [vmem:[%s1844_s2 + $0x34] ss:$8 sps:$4 sm:$0xff] (!%p229_p10)   ;;  %v1370_v11 = vld [vmem:[%s1844_s2 + $0x30] ss:$8 sps:$4 sm:$0xff] (!%p229_p10)  }
  0x17   : > { %1210 = vmatprep.subr.bf16.mxu1 (!%p229_p10), %v1361_v5  ;;  %v1371_v12 = vld [vmem:[%s1844_s2 + $0x44] ss:$8 sps:$4 sm:$0xff] (!%p229_p10)   ;;  %v1373_v13 = vld [vmem:[%s1844_s2 + $0x40] ss:$8 sps:$4 sm:$0xff] (!%p229_p10)   ;;  %v1374_v15 = vld [vmem:[%s1844_s2 + $0x54] ss:$8 sps:$4 sm:$0xff] (!%p229_p10)  }
  0x18   : > { %v1376_v16 = vld [vmem:[%s1844_s2 + $0x50] ss:$8 sps:$4 sm:$0xff] (!%p229_p10)   ;;  %v1377_v17 = vld [vmem:[%s1844_s2 + $0x64] ss:$8 sps:$4 sm:$0xff] (!%p229_p10)   ;;  %v1379_v18 = vld [vmem:[%s1844_s2 + $0x60] ss:$8 sps:$4 sm:$0xff] (!%p229_p10)  }
  0x19   : > { %v1380_v19 = vld [vmem:[%s1844_s2 + $0x74] ss:$8 sps:$4 sm:$0xff] (!%p229_p10)   ;;  %v1383_v20 = vld [vmem:[%s1844_s2 + $0x70] ss:$8 sps:$4 sm:$0xff] (!%p229_p10)   ;;  %v545_v24 = vshrl.u32 (!%p229_p10), %v544_v23, 7  ;;  %vm638_vm1 = vcmask (!%p229_p10), 125952  }
  0x1a   : > { %s271_s12 = scalar_select %p270_p12, %s1456_s22, 1  ;;  %1218 = vmatpush1.bf16.msra.mxu1 %v1363_v6  ;;  %v542_v25 = vld [vmem:[%s1846_s4] sm:$0x3] }
  0x1b   : > { %v1358_v3 = vld [vmem:[%s1851_s3 + $0x4] ss:$8 sps:$4 sm:$0xff]   ;;  %v1360_v4 = vld [vmem:[%s1851_s3] ss:$8 sps:$4 sm:$0xff]   ;;  %s273_s13 = scalar_select %p272_p13, %s1589_s14, 7  ;;  %1211 = vmatprep.subr.bf16.mxu1 %v1365_v7  ;;  %v550_v26 = vsub.s32 1, %v545_v24 }
  0x1c   : > { %344 = vmatprep.subr.bf16.mxu0 %v1358_v3  ;;  %s1082_s17 = sshll.u32 %s271_s12, 3  ;;  %v546_v32 = vsub.s32 0, %v545_v24  ;;  %v1477_v24 = vmov 6  }
  0x1d   : > { %345 = vmatpush1.bf16.msra.mxu0 %v1360_v4  ;;  %s275_s26 = sadd.s32 %s1082_s17, %s273_s13  ;;  %v551_v27 = vrot.slane %v542_v25, %v550_v26 }
  0x1e   : > { %489 = vmatprep.subr.bf16.mxu0 %v1355_v0  ;;  %s1083_s21 = sshll.u32 %s275_s26, 2  ;;  %1219 = vmatpush1.bf16.msra.mxu1 %v1367_v8  ;;  %v547_v33 = vrot.slane %v542_v25, %v546_v32 }
  0x1f   : > { %s287_s10 = scalar_lea.vmem %s1843_s1, %s1083_s21  ;;  %1212 = vmatprep.subr.bf16.mxu1 %v1368_v9  ;;  %s1636_s27 = scalar_lea.vmem %s1842_s0, %s1083_s21 }
  0x20   : > { %v1364_v10 = vld [vmem:[%s287_s10] sm:$0xff]   ;;  %v1382_v14 = vld [vmem:[%s287_s10 + $0x8] sm:$0xff]  }
  0x21   : > { %1091 = vmatmul.mubr.msk.bf16.vlgmr.msra.gmra.mrb[0].mxu0 %vm337_vm0, %v1364_v10  ;;  %v1384_v21 = vld [vmem:[%s1636_s27 + $0x8] sm:$0xff]   ;;  %v1385_v22 = vld [vmem:[%s1636_s27] sm:$0xff]   ;;  %s266_s27 = sand.u32 1, %s1444_s19  }
  0x22   : > { %490 = vmatpush1.bf16.msra.mxu0 %v1357_v1  ;;  %386 = vmatprep.mubr.bf16.mxu0 %v1470_v2  ;;  %s1080_s12 = sshll.u32 %s266_s27, 7  ;;  %s931_s21 = scalar_lea.sflag [#allocation3], %s266_s27 }
  0x23   : > { %491 = vmatprep.subr.bf16.mxu0 %v1361_v5  ;;  %1220 = vmatpush1.bf16.msra.mxu1 %v1370_v11  ;;  %s1695_s13 = scalar_lea.vmem [#allocation2], %s1080_s12 }
  0x24   : > { %1213 = vmatprep.subr.bf16.mxu1 %v1371_v12 }
  0x26   : > { %492 = vmatpush1.bf16.msra.mxu0 %v1363_v6 }
  0x27   : > { %493 = vmatprep.subr.bf16.mxu0 %v1365_v7  ;;  %1221 = vmatpush1.bf16.msra.mxu1 %v1373_v13  ;;  %v1471_v7 = vmov 3  }
  0x28   : > { %1214 = vmatprep.subr.bf16.mxu1 %v1374_v15  ;;  %1334 = vset.pattern.permute.xlu0 %v1471_v7 }
  0x29   : > { %1092 = vmatmul.mubr.msk.bf16.gmra.mrb[4].mxu0 %vm337_vm0, %v1382_v14 }
  0x2a   : > { %494 = vmatpush1.bf16.msra.mxu0 %v1367_v8  ;;  %521 = vmatprep.mubr.bf16.mxu0 %v1470_v2 }
  0x2b   : > { %495 = vmatprep.subr.bf16.mxu0 %v1368_v9  ;;  %1222 = vmatpush1.bf16.msra.mxu1 %v1376_v16 }
  0x2c   : > { %1215 = vmatprep.subr.bf16.mxu1 %v1377_v17 }
  0x2e   : > { %496 = vmatpush1.bf16.msra.mxu0 %v1370_v11 }
  0x2f   : > { %497 = vmatprep.subr.bf16.mxu0 %v1371_v12  ;;  %1223 = vmatpush1.bf16.msra.mxu1 %v1379_v18 }
  0x30   : > { %1216 = vmatprep.subr.bf16.mxu1 %v1380_v19 }
  0x32   : > { %498 = vmatpush1.bf16.msra.mxu0 %v1373_v13 }
  0x33   : > { %499 = vmatprep.subr.bf16.mxu0 %v1374_v15  ;;  %1224 = vmatpush1.bf16.msra.mxu1 %v1383_v20  ;;  %v1472_v15 = vmov 1  }
  0x36   : > { %500 = vmatpush1.bf16.msra.mxu0 %v1376_v16  ;;  %532 = vmatmul.mubr.bf16.vlgmr.msra.gmra.mrb[0].mxu1 %v1384_v21  ;;  %v1473_v16 = vmov 5   ;;  %v1475_v21 = vmov 4  }
  0x37   : > { %501 = vmatprep.subr.bf16.mxu0 %v1377_v17 }
  0x3a   : > { %502 = vmatpush1.bf16.msra.mxu0 %v1379_v18  ;;  %v1474_v18 = vmov 2  }
  0x3b   : > { %503 = vmatprep.subr.bf16.mxu0 %v1380_v19 }
  0x3e   : > { %504 = vmatpush1.bf16.msra.mxu0 %v1383_v20 }
  0x41   : > { %522 = vmatmul.mubr.bf16.vlgmr.msra.gmra.mrb[0].mxu0 %v1385_v22  ;;  %v1476_v22 = vmov 7  }
  0xfc   : > { %v388_v28 = vpop.f32.mrb[4].mxu0 }
  0xfd   : > { %v390_v29 = vpop.f32.mrb[5].mxu0 }
  0xfe   : > { %v392_v30 = vpop.f32.mrb[6].mxu0 }
  0xff   : > { %v394_v31 = vpop.f32.mrb[7].mxu0 }
 0x109   : > { %v533_v34 = vpop.f32.mrb[0].mxu1 }
 0x10a   : > { %v534_v35 = vadd.f32 %v533_v34, %v388_v28  ;;  %v535_v36 = vpop.f32.mrb[1].mxu1 }
 0x10b   : > { %v536_v37 = vadd.f32 %v535_v36, %v390_v29  ;;  %v537_v38 = vpop.f32.mrb[2].mxu1 }
 0x10c   : > { %v538_v39 = vadd.f32 %v537_v38, %v392_v30  ;;  %v539_v40 = vpop.f32.mrb[3].mxu1  ;;  %v558_v41 = vadd.f32 %v547_v33, %v534_v35 }
 0x10d   : > { %v1666_v42 = vadd.f32 %v551_v27, %v536_v37  ;;  %v540_v43 = vadd.f32 %v539_v40, %v394_v31 }
 0x10e   : > { %566 = vmax.xlane.f32.xlu1 %v558_v41  ;;  %v560_v45 = vadd.f32 %v547_v33, %v538_v39 }
 0x10f   : > { %v1668_v44 = vadd.f32 %v551_v27, %v540_v43 }
 0x112   : > { %568 = vmax.xlane.f32.xlu1 %v560_v45 }
 0x114   : > { %v523_v46 = vpop.f32.mrb[0].mxu0 }
 0x115   : > { %v554_v47 = vadd.f32 %v547_v33, %v523_v46  ;;  %v525_v48 = vpop.f32.mrb[1].mxu0 }
 0x116   : > { %v1670_v49 = vadd.f32 %v551_v27, %v525_v48  ;;  %v527_v50 = vpop.f32.mrb[2].mxu0 }
 0x117   : > { %562 = vmax.xlane.f32.xlu0 %v554_v47  ;;  %v529_v51 = vpop.f32.mrb[3].mxu0  ;;  %v556_v53 = vadd.f32 %v547_v33, %v527_v50 }
 0x118   : > { %v1672_v52 = vadd.f32 %v551_v27, %v529_v51 }
 0x11b   : > { %564 = vmax.xlane.f32.xlu0 %v556_v53 }
 0x19b   : > { %v567_v54 = vpop.xlane.xlu1 %566 }
 0x19c   : > { %v572_v55 = vsub.f32 %v558_v41, %v567_v54 }
 0x19e   : > { %v578_v56 = vmul.f32 1.442695, %v572_v55 }
 0x19f   : > { %v569_v57 = vpop.xlane.xlu1 %568 }
 0x1a0   : > { %1386 = vpow2.f32 %v578_v56  ;;  %v573_v58 = vsub.f32 %v560_v45, %v569_v57 }
 0x1a2   : > { %v580_v59 = vmul.f32 1.442695, %v573_v58 }
 0x1a4   : > { %v563_v60 = vpop.xlane.xlu0 %562  ;;  %1388 = vpow2.f32 %v580_v59 }
 0x1a5   : > { %v570_v61 = vsub.f32 %v554_v47, %v563_v60 }
 0x1a7   : > { %v574_v62 = vmul.f32 1.442695, %v570_v61 }
 0x1a8   : > { %v565_v63 = vpop.xlane.xlu0 %564 }
 0x1a9   : > { %1390 = vpow2.f32 %v574_v62  ;;  %v571_v0 = vsub.f32 %v556_v53, %v565_v63 }
 0x1aa   : > { %v1387_v3 = vpop.eup %1386 }
 0x1ab   : > { %v576_v1 = vmul.f32 1.442695, %v571_v0  ;;  %586 = vadd.xlane.f32.xlu0 %v1387_v3 }
 0x1ad   : > { %1392 = vpow2.f32 %v576_v1 }
 0x1ae   : > { %v1389_v4 = vpop.eup %1388 }
 0x1af   : > { %588 = vadd.xlane.f32.xlu1 %v1389_v4 }
 0x1b3   : > { %v1391_v5 = vpop.eup %1390 }
 0x1b4   : > { %582 = vadd.xlane.f32.xlu0 %v1391_v5 }
 0x1b7   : > { %v1393_v6 = vpop.eup %1392 }
 0x1b8   : > { %584 = vadd.xlane.f32.xlu1 %v1393_v6 }
 0x238   : > { %v587_v8 = vpop.xlane.xlu0 %586 }
 0x239   : > { %1394 = vrcp.f32 %v587_v8 }
 0x23c   : > { %v589_v9 = vpop.xlane.xlu1 %588 }
 0x23d   : > { %1396 = vrcp.f32 %v589_v9 }
 0x241   : > { %v583_v10 = vpop.xlane.xlu0 %582 }
 0x242   : > { %1398 = vrcp.f32 %v583_v10 }
 0x243   : > { %v1395_v11 = vpop.eup %1394 }
 0x244   : > { %v1675_v12 = vmul.f32 %v1395_v11, %v1387_v3 }
 0x245   : > { %v585_v20 = vpop.xlane.xlu1 %584 }
 0x246   : > { %610 = vperm.xlu1 %1324, %v1675_v12   ;;  %1400 = vrcp.f32 %v585_v20 }
 0x247   : > { %v1397_v13 = vpop.eup %1396 }
 0x248   : > { %v597_v14 = vmul.f32 %v1397_v13, %v1389_v4 }
 0x24a   : > { %738 = vperm.xlu0 %1334, %v597_v14   ;;  %1325 = vset.pattern.permute.xlu1 %v1472_v15 }
 0x24b   : > { %652 = vperm.xlu1 %1325, %v1675_v12  }
 0x24c   : > { %v1399_v17 = vpop.eup %1398 }
 0x24d   : > { %v594_v19 = vmul.f32 %v1399_v17, %v1391_v5 }
 0x24e   : > { %1336 = vset.pattern.permute.xlu0 %v1473_v16 }
 0x24f   : > { %820 = vperm.xlu0 %1336, %v597_v14   ;;  %1326 = vset.pattern.permute.xlu1 %v1474_v18 }
 0x250   : > { %693 = vperm.xlu1 %1326, %v1675_v12   ;;  %v1401_v23 = vpop.eup %1400 }
 0x251   : > { %v595_v25 = vmul.f32 %v1401_v23, %v1393_v6 }
 0x253   : > { %1338 = vset.pattern.permute.xlu0 %v1470_v2 }
 0x254   : > { %1327 = vset.pattern.permute.xlu1 %v1471_v7  ;;  %600 = vperm.xlu0 %1338, %v594_v19  }
 0x255   : > { %734 = vperm.xlu1 %1327, %v1675_v12  }
 0x258   : > { %1341 = vset.pattern.permute.xlu0 %v1471_v7 }
 0x259   : > { %1328 = vset.pattern.permute.xlu1 %v1475_v21  ;;  %726 = vperm.xlu0 %1341, %v594_v19  }
 0x25a   : > { %775 = vperm.xlu1 %1328, %v1675_v12  }
 0x25d   : > { %1343 = vset.pattern.permute.xlu0 %v1473_v16 }
 0x25e   : > { %1329 = vset.pattern.permute.xlu1 %v1473_v16  ;;  %808 = vperm.xlu0 %1343, %v594_v19  }
 0x25f   : > { %816 = vperm.xlu1 %1329, %v1675_v12  }
 0x262   : > { %1345 = vset.pattern.permute.xlu0 %v1476_v22 }
 0x263   : > { %1330 = vset.pattern.permute.xlu1 %v1477_v24  ;;  %890 = vperm.xlu0 %1345, %v594_v19  }
 0x264   : > { %857 = vperm.xlu1 %1330, %v1675_v12  }
 0x267   : > { %1348 = vset.pattern.permute.xlu0 %v1474_v18 }
 0x268   : > { %1331 = vset.pattern.permute.xlu1 %v1470_v2  ;;  %689 = vperm.xlu0 %1348, %v595_v25  }
 0x269   : > { %615 = vperm.xlu1 %1331, %v597_v14  }
 0x26c   : > { %1350 = vset.pattern.permute.xlu0 %v1475_v21 }
 0x26d   : > { %1332 = vset.pattern.permute.xlu1 %v1472_v15  ;;  %771 = vperm.xlu0 %1350, %v595_v25  }
 0x26e   : > { %656 = vperm.xlu1 %1332, %v597_v14  }
 0x271   : > { %1352 = vset.pattern.permute.xlu0 %v1477_v24 }
 0x272   : > { %1333 = vset.pattern.permute.xlu1 %v1474_v18  ;;  %853 = vperm.xlu0 %1352, %v595_v25  }
 0x273   : > { %697 = vperm.xlu1 %1333, %v597_v14  }
 0x276   : > { %1354 = vset.pattern.permute.xlu0 %v1476_v22 }
 0x277   : > { %1335 = vset.pattern.permute.xlu1 %v1475_v21  ;;  %902 = vperm.xlu0 %1354, %v597_v14  }
 0x278   : > { %779 = vperm.xlu1 %1335, %v597_v14  }
 0x27c   : > { %1337 = vset.pattern.permute.xlu1 %v1477_v24 }
 0x27d   : > { %861 = vperm.xlu1 %1337, %v597_v14  }
 0x281   : > { %1339 = vset.pattern.permute.xlu1 %v1472_v15 }
 0x282   : > { %644 = vperm.xlu1 %1339, %v594_v19  }
 0x286   : > { %1340 = vset.pattern.permute.xlu1 %v1474_v18 }
 0x287   : > { %685 = vperm.xlu1 %1340, %v594_v19  }
 0x28b   : > { %1342 = vset.pattern.permute.xlu1 %v1475_v21 }
 0x28c   : > { %767 = vperm.xlu1 %1342, %v594_v19  }
 0x290   : > { %1344 = vset.pattern.permute.xlu1 %v1477_v24 }
 0x291   : > { %849 = vperm.xlu1 %1344, %v594_v19  }
 0x295   : > { %1346 = vset.pattern.permute.xlu1 %v1470_v2 }
 0x296   : > { %605 = vperm.xlu1 %1346, %v595_v25  }
 0x29a   : > { %1347 = vset.pattern.permute.xlu1 %v1472_v15 }
 0x29b   : > { %648 = vperm.xlu1 %1347, %v595_v25  }
 0x29f   : > { %1349 = vset.pattern.permute.xlu1 %v1471_v7 }
 0x2a0   : > { %730 = vperm.xlu1 %1349, %v595_v25  }
 0x2a4   : > { %1351 = vset.pattern.permute.xlu1 %v1473_v16 }
 0x2a5   : > { %812 = vperm.xlu1 %1351, %v595_v25  }
 0x2a9   : > { %1353 = vset.pattern.permute.xlu1 %v1476_v22 }
 0x2aa   : > { %894 = vperm.xlu1 %1353, %v595_v25  }
 0x2ae   : > { %898 = vperm.xlu1 %1353, %v1675_v12  }
 0x2c5   : > { %v611_v26 = vpop.permute.xlu1 %610 }
 0x2c6   : > { %v620_v27 = vmul.f32 %v611_v26, %v1666_v42 }
 0x2c8   : > { %v1179_v28 = vpack.c.bf16 %v620_v27, %v620_v27 }
 0x2c9   : > { %v739_v2 = vpop.permute.xlu0 %738 }
 0x2ca   : > { %641 = vst.msk [vmem:[%s1695_s13 + $0x8] sm:$0xf] %vm638_vm1, %v1179_v28  ;;  %v744_v29 = vmul.f32 %v739_v2, %v1668_v44  ;;  %v653_v30 = vpop.permute.xlu1 %652 }
 0x2cb   : > { %v661_v31 = vmul.f32 %v653_v30, %v1666_v42 }
 0x2cc   : > { %v1192_v32 = vpack.c.bf16 %v744_v29, %v744_v29 }
 0x2cd   : > { %v1183_v33 = vpack.c.bf16 %v661_v31, %v661_v31 }
 0x2ce   : > { %1138 = vst.msk [vmem:[%s1695_s13 + $0x3c] sm:$0xf] %vm638_vm1, %v1192_v32  ;;  %v821_v34 = vpop.permute.xlu0 %820 }
 0x2cf   : > { %1121 = vst.msk [vmem:[%s1695_s13 + $0x18] sm:$0xf] %vm638_vm1, %v1183_v33  ;;  %v826_v35 = vmul.f32 %v821_v34, %v1668_v44  ;;  %v694_v36 = vpop.permute.xlu1 %693 }
 0x2d0   : > { %v702_v37 = vmul.f32 %v694_v36, %v1666_v42 }
 0x2d1   : > { %v1200_v38 = vpack.c.bf16 %v826_v35, %v826_v35 }
 0x2d2   : > { %v1187_v39 = vpack.c.bf16 %v702_v37, %v702_v37 }
 0x2d3   : > { %1154 = vst.msk [vmem:[%s1695_s13 + $0x5c] sm:$0xf] %vm638_vm1, %v1200_v38  ;;  %v601_v40 = vpop.permute.xlu0 %600 }
 0x2d4   : > { %1129 = vst.msk [vmem:[%s1695_s13 + $0x28] sm:$0xf] %vm638_vm1, %v1187_v39  ;;  %v618_v41 = vmul.f32 %v601_v40, %v1670_v49  ;;  %v735_v43 = vpop.permute.xlu1 %734 }
 0x2d5   : > { %v743_v45 = vmul.f32 %v735_v43, %v1666_v42 }
 0x2d6   : > { %v1177_v46 = vpack.c.bf16 %v618_v41, %v618_v41 }
 0x2d7   : > { %v1191_v47 = vpack.c.bf16 %v743_v45, %v743_v45 }
 0x2d8   : > { %639 = vst.msk [vmem:[%s1695_s13] sm:$0xf] %vm638_vm1, %v1177_v46  ;;  %v727_v48 = vpop.permute.xlu0 %726 }
 0x2d9   : > { %1137 = vst.msk [vmem:[%s1695_s13 + $0x38] sm:$0xf] %vm638_vm1, %v1191_v47  ;;  %v741_v50 = vmul.f32 %v727_v48, %v1670_v49  ;;  %v776_v51 = vpop.permute.xlu1 %775 }
 0x2da   : > { %v784_v53 = vmul.f32 %v776_v51, %v1666_v42 }
 0x2db   : > { %v1189_v54 = vpack.c.bf16 %v741_v50, %v741_v50 }
 0x2dc   : > { %v1195_v55 = vpack.c.bf16 %v784_v53, %v784_v53 }
 0x2dd   : > { %1135 = vst.msk [vmem:[%s1695_s13 + $0x30] sm:$0xf] %vm638_vm1, %v1189_v54  ;;  %v809_v56 = vpop.permute.xlu0 %808 }
 0x2de   : > { %1145 = vst.msk [vmem:[%s1695_s13 + $0x48] sm:$0xf] %vm638_vm1, %v1195_v55  ;;  %v823_v57 = vmul.f32 %v809_v56, %v1670_v49  ;;  %v817_v58 = vpop.permute.xlu1 %816 }
 0x2df   : > { %v825_v59 = vmul.f32 %v817_v58, %v1666_v42 }
 0x2e0   : > { %v1197_v60 = vpack.c.bf16 %v823_v57, %v823_v57 }
 0x2e1   : > { %v1199_v61 = vpack.c.bf16 %v825_v59, %v825_v59 }
 0x2e2   : > { %1151 = vst.msk [vmem:[%s1695_s13 + $0x50] sm:$0xf] %vm638_vm1, %v1197_v60  ;;  %v891_v62 = vpop.permute.xlu0 %890 }
 0x2e3   : > { %1153 = vst.msk [vmem:[%s1695_s13 + $0x58] sm:$0xf] %vm638_vm1, %v1199_v61  ;;  %v905_v63 = vmul.f32 %v891_v62, %v1670_v49  ;;  %v858_v0 = vpop.permute.xlu1 %857 }
 0x2e4   : > { %v866_v1 = vmul.f32 %v858_v0, %v1666_v42 }
 0x2e5   : > { %v1205_v3 = vpack.c.bf16 %v905_v63, %v905_v63 }
 0x2e6   : > { %v1203_v4 = vpack.c.bf16 %v866_v1, %v866_v1 }
 0x2e7   : > { %1167 = vst.msk [vmem:[%s1695_s13 + $0x70] sm:$0xf] %vm638_vm1, %v1205_v3  ;;  %v690_v5 = vpop.permute.xlu0 %689 }
 0x2e8   : > { %1161 = vst.msk [vmem:[%s1695_s13 + $0x68] sm:$0xf] %vm638_vm1, %v1203_v4  ;;  %v701_v6 = vmul.f32 %v690_v5, %v1672_v52  ;;  %v616_v7 = vpop.permute.xlu1 %615 }
 0x2e9   : > { %v621_v8 = vmul.f32 %v616_v7, %v1668_v44 }
 0x2ea   : > { %v1186_v9 = vpack.c.bf16 %v701_v6, %v701_v6 }
 0x2eb   : > { %v1180_v10 = vpack.c.bf16 %v621_v8, %v621_v8 }
 0x2ec   : > { %1128 = vst.msk [vmem:[%s1695_s13 + $0x24] sm:$0xf] %vm638_vm1, %v1186_v9  ;;  %v772_v11 = vpop.permute.xlu0 %771 }
 0x2ed   : > { %642 = vst.msk [vmem:[%s1695_s13 + $0xc] sm:$0xf] %vm638_vm1, %v1180_v10  ;;  %v783_v12 = vmul.f32 %v772_v11, %v1672_v52  ;;  %v657_v13 = vpop.permute.xlu1 %656 }
 0x2ee   : > { %v662_v14 = vmul.f32 %v657_v13, %v1668_v44 }
 0x2ef   : > { %v1194_v15 = vpack.c.bf16 %v783_v12, %v783_v12 }
 0x2f0   : > { %v1184_v16 = vpack.c.bf16 %v662_v14, %v662_v14 }
 0x2f1   : > { %1144 = vst.msk [vmem:[%s1695_s13 + $0x44] sm:$0xf] %vm638_vm1, %v1194_v15  ;;  %v854_v17 = vpop.permute.xlu0 %853 }
 0x2f2   : > { %1122 = vst.msk [vmem:[%s1695_s13 + $0x1c] sm:$0xf] %vm638_vm1, %v1184_v16  ;;  %v865_v18 = vmul.f32 %v854_v17, %v1672_v52  ;;  %v698_v19 = vpop.permute.xlu1 %697 }
 0x2f3   : > { %v703_v20 = vmul.f32 %v698_v19, %v1668_v44 }
 0x2f4   : > { %v1202_v21 = vpack.c.bf16 %v865_v18, %v865_v18 }
 0x2f5   : > { %v1188_v22 = vpack.c.bf16 %v703_v20, %v703_v20 }
 0x2f6   : > { %1160 = vst.msk [vmem:[%s1695_s13 + $0x64] sm:$0xf] %vm638_vm1, %v1202_v21  ;;  %v903_v23 = vpop.permute.xlu0 %902 }
 0x2f7   : > { %1130 = vst.msk [vmem:[%s1695_s13 + $0x2c] sm:$0xf] %vm638_vm1, %v1188_v22  ;;  %v908_v24 = vmul.f32 %v903_v23, %v1668_v44  ;;  %v780_v25 = vpop.permute.xlu1 %779 }
 0x2f8   : > { %v785_v26 = vmul.f32 %v780_v25, %v1668_v44 }
 0x2f9   : > { %v1208_v27 = vpack.c.bf16 %v908_v24, %v908_v24 }
 0x2fa   : > { %v1196_v28 = vpack.c.bf16 %v785_v26, %v785_v26 }
 0x2fb   : > { %1170 = vst.msk [vmem:[%s1695_s13 + $0x7c] sm:$0xf] %vm638_vm1, %v1208_v27 }
 0x2fc   : > { %1146 = vst.msk [vmem:[%s1695_s13 + $0x4c] sm:$0xf] %vm638_vm1, %v1196_v28  ;;  %v862_v2 = vpop.permute.xlu1 %861 }
 0x2fd   : > { %v867_v29 = vmul.f32 %v862_v2, %v1668_v44 }
 0x2ff   : > { %v1204_v30 = vpack.c.bf16 %v867_v29, %v867_v29 }
 0x301   : > { %1162 = vst.msk [vmem:[%s1695_s13 + $0x6c] sm:$0xf] %vm638_vm1, %v1204_v30  ;;  %v645_v31 = vpop.permute.xlu1 %644 }
 0x302   : > { %v659_v32 = vmul.f32 %v645_v31, %v1670_v49 }
 0x304   : > { %v1181_v33 = vpack.c.bf16 %v659_v32, %v659_v32 }
 0x306   : > { %1119 = vst.msk [vmem:[%s1695_s13 + $0x10] sm:$0xf] %vm638_vm1, %v1181_v33  ;;  %v686_v34 = vpop.permute.xlu1 %685 }
 0x307   : > { %v700_v35 = vmul.f32 %v686_v34, %v1670_v49 }
 0x309   : > { %v1185_v36 = vpack.c.bf16 %v700_v35, %v700_v35 }
 0x30b   : > { %1127 = vst.msk [vmem:[%s1695_s13 + $0x20] sm:$0xf] %vm638_vm1, %v1185_v36  ;;  %v768_v37 = vpop.permute.xlu1 %767 }
 0x30c   : > { %v782_v44 = vmul.f32 %v768_v37, %v1670_v49 }
 0x30e   : > { %v1193_v38 = vpack.c.bf16 %v782_v44, %v782_v44 }
 0x310   : > { %1143 = vst.msk [vmem:[%s1695_s13 + $0x40] sm:$0xf] %vm638_vm1, %v1193_v38  ;;  %v850_v39 = vpop.permute.xlu1 %849 }
 0x311   : > { %v864_v40 = vmul.f32 %v850_v39, %v1670_v49 }
 0x313   : > { %v1201_v41 = vpack.c.bf16 %v864_v40, %v864_v40 }
 0x315   : > { %1159 = vst.msk [vmem:[%s1695_s13 + $0x60] sm:$0xf] %vm638_vm1, %v1201_v41  ;;  %v606_v43 = vpop.permute.xlu1 %605 }
 0x316   : > { %v619_v45 = vmul.f32 %v606_v43, %v1672_v52 }
 0x318   : > { %v1178_v46 = vpack.c.bf16 %v619_v45, %v619_v45 }
 0x31a   : > { %640 = vst.msk [vmem:[%s1695_s13 + $0x4] sm:$0xf] %vm638_vm1, %v1178_v46  ;;  %v649_v47 = vpop.permute.xlu1 %648 }
 0x31b   : > { %v660_v48 = vmul.f32 %v649_v47, %v1672_v52 }
 0x31d   : > { %v1182_v50 = vpack.c.bf16 %v660_v48, %v660_v48 }
 0x31f   : > { %1120 = vst.msk [vmem:[%s1695_s13 + $0x14] sm:$0xf] %vm638_vm1, %v1182_v50  ;;  %v731_v51 = vpop.permute.xlu1 %730 }
 0x320   : > { %v742_v49 = vmul.f32 %v731_v51, %v1672_v52 }
 0x322   : > { %v1190_v53 = vpack.c.bf16 %v742_v49, %v742_v49 }
 0x324   : > { %1136 = vst.msk [vmem:[%s1695_s13 + $0x34] sm:$0xf] %vm638_vm1, %v1190_v53  ;;  %v813_v54 = vpop.permute.xlu1 %812 }
 0x325   : > { %v824_v55 = vmul.f32 %v813_v54, %v1672_v52 }
 0x327   : > { %v1198_v56 = vpack.c.bf16 %v824_v55, %v824_v55 }
 0x329   : > { %1152 = vst.msk [vmem:[%s1695_s13 + $0x54] sm:$0xf] %vm638_vm1, %v1198_v56  ;;  %v895_v57 = vpop.permute.xlu1 %894 }
 0x32a   : > { %v906_v58 = vmul.f32 %v895_v57, %v1672_v52 }
 0x32c   : > { %v1206_v59 = vpack.c.bf16 %v906_v58, %v906_v58 }
 0x32d   : > { %v899_v60 = vpop.permute.xlu1 %898 }
 0x32e   : > { %1168 = vst.msk [vmem:[%s1695_s13 + $0x74] sm:$0xf] %vm638_vm1, %v1206_v59  ;;  %v907_v61 = vmul.f32 %v899_v60, %v1666_v42 }
 0x330   : > { %v1207_v62 = vpack.c.bf16 %v907_v61, %v907_v61 }
 0x332   : > { %1169 = vst.msk [vmem:[%s1695_s13 + $0x78] sm:$0xf] %vm638_vm1, %v1207_v62 }
 0x333   : > { %s1173_s16 = sshll.u32 %s1456_s22, 6  ;;  %s962_s10 = sshll.u32 %s1695_s13, 4  ;;  %s963_s10 = int_to_ptr.vmem [resolvable:$true] %s962_s10 }
 0x334   : > { %s943_s17 = sadd.s32 %s1173_s16, %s1589_s14  ;;  %s1478_s9 = smov 256  }
 0x335   : > { %s1174_s26 = sshll.u32 %s943_s17, 6  ;;  %1233 = sst [smem:[#allocation5]] (%p1565_p3), %s1478_s9 }
 0x336   : > { %s945_s8 = scalar_lea.hbm %s1847_s5, %s1174_s26  ;;  %s1479_s15 = smov 512  }
 0x337   : > { %1234 = sst [smem:[#allocation5 + $0x1]] (%p1565_p3), %s1479_s15  ;;  %s1480_s27 = smov 4  }
 0x338   : > { %1235 = sst [smem:[#allocation5 + $0x2]] (%p1565_p3), %s1480_s27  ;;  %s1481_s12 = smov 64  }
 0x339   : > { %1236 = sst [smem:[#allocation5 + $0x3]] (%p1565_p3), %s1481_s12  ;;  %s1482_s22 = smov [#allocation4]  }
 0x33a   : > { %1237 = sst [smem:[#allocation5 + $0x4]] (%p1565_p3), %s1481_s12  ;;  %s1483_s14 = smov 0  }
 0x33b   : > { %1238 = sst [smem:[#allocation5 + $0x5]] (%p1565_p3), %s1480_s27 }
 0x33c   : > { %1239 = dma.general (%p1565_p3), %s963_s10, 2048, %s945_s8, %s931_s21, %s1482_s22, [#allocation5], %s1483_s14, 0  }
 0x33d PF: > { %p1245_p0 = scmp.ge.s32.totalorder %s1468_s25, 2  ;;  %s990_s13 = sand.u32 1, %s1440_s18  }
 0x33e   : > { %s991_s16 = scalar_lea.sflag [#allocation3], %s990_s13 }
 0x33f   : > { %p1242_p1 = pnand %p1245_p0, %p1574_p8 }
 0x341   : > { %1435 = dma.done.wait (!%p1242_p1), %s991_s16, 2048  }
 0x342   : > { %1437 = vsyncadd (!%p1242_p1), %s991_s16, 4294965248  ;;  %s18_s25 = sadd.s32 1, %s1468_s25   ;;  %s1852_s18 = smov %s1444_s19 }
 0x343   : > { %p15_p2 = scmp.ge.s32.totalorder %s18_s25, 6   ;;  %s1853_s19 = smov %s1448_s20 }
 0x344   : > { %s1854_s20 = smov %s1583_s11  ;;  %s1855_s21 = smov %s1460_s23 }
 0x345   : > { %s1856_s22 = smov %s1464_s24  ;;  %s1857_s23 = smov %s1860_s28 }
 0x346   : > { %s1858_s24 = smov %s1864_s29  ;;  %17 = sbr.rel (!%p15_p2) target bundleno = 7 (0x7), region = 90 }
 0x34d   :  { %996 = vsyncpa [#allocation3], 1 }
 0x34e   :  { %998 = vsyncpa [#allocation3 + $0x1], 1 }

</bundles_post_ra>
